<compile_context>
chip_gen: v5e
topology: v5e:2x2
jax: 0.10.0
libtpu: 0.0.40
codegen_flags: <defaults>
</compile_context>

<pallas_src>
import jax
import jax.numpy as jnp
from jax.experimental import pallas as pl
from jax.experimental.pallas import tpu as pltpu


def attention_kernel(enc_ref, dec_ref, we_ref, wd_ref, batt_ref, wf_ref, bf_ref,
                     awe_ref, alpha_ref):
    TB, P, E = enc_ref.shape
    A = we_ref.shape[1]

    enc = enc_ref[...]                                           # (TB, P, E) storage dtype

    # encoder_att: one flattened (TB*P, E) @ (E, A) MXU matmul, f32 accumulation.
    att1 = jnp.dot(enc.reshape(TB * P, E), we_ref[...],
                   preferred_element_type=jnp.float32)            # (TB*P, A)

    # decoder_att + folded (b_enc + b_dec) added on the small (TB, A) tensor only
    # (saves a VPU broadcast-add pass over the big (TB*P, A) tensor).
    att2 = jnp.dot(dec_ref[...], wd_ref[...],
                   preferred_element_type=jnp.float32) + batt_ref[...]   # (TB, A)

    # relu(att1 + att2.unsqueeze(1)); all elementwise math stays f32 (v5e-safe).
    s = jnp.maximum(att1.reshape(TB, P, A) + att2[:, None, :], 0.0)      # (TB, P, A)

    # full_att: multiply by the (1,1,A) weight row once, then reduce over A in the
    # two layouts the consumers need (avoids a lane<->sublane relayout of alpha):
    #   row    (TB, P):    pixels on the 128-lane axis -> contiguous alpha store
    #   column (TB, P, 1): pixels on sublanes -> lane-broadcasts over E for the
    #                      VPU weighted sum.
    sw = s * wf_ref[...].reshape(1, 1, A)                                # (TB, P, A)

    # ---- row softmax (alpha output) ----
    att_r = jnp.sum(sw, axis=-1) + bf_ref[...]                           # (TB, P)
    m_r = jnp.max(att_r, axis=-1, keepdims=True)
    e_r = jnp.exp(att_r - m_r)
    alpha_r = e_r * pl.reciprocal(jnp.sum(e_r, axis=-1, keepdims=True),
                                  approx=True)                           # (TB, P)
    alpha_ref[...] = alpha_r.astype(alpha_ref.dtype)

    # ---- column softmax (weighted encoding); b_full skipped since
    #      softmax(x + c) == softmax(x) ----
    att_c = jnp.sum(sw, axis=-1, keepdims=True)                          # (TB, P, 1)
    m_c = jnp.max(att_c, axis=1, keepdims=True)                          # (TB, 1, 1)
    e_c = jnp.exp(att_c - m_c)
    alpha_c = e_c * pl.reciprocal(jnp.sum(e_c, axis=1, keepdims=True),
                                  approx=True)                           # (TB, P, 1)

    # attention-weighted encoding on the VPU/XLU (multiply + sublane reduce):
    # no per-batch M=1 MXU matmul, no RHS pushes of the enc tile competing with
    # encoder_att on the vector-extended slot. alpha stays f32.
    awe = jnp.sum(enc.astype(jnp.float32) * alpha_c, axis=1)             # (TB, E) f32
    awe_ref[...] = awe.astype(awe_ref.dtype)


def _tpu_vmem_bytes():
    """Physical VMEM per TensorCore; conservative (v7x-sized) fallback."""
    try:
        return int(pltpu.get_tpu_info().vmem_capacity_bytes)
    except Exception:
        return 64 << 20


def _estimate_vmem_bytes(tb, P, E, D, A, enc_bytes, w_bytes, enc_buffers):
    """Per-kernel VMEM footprint: pipelined input/output buffers, (double-buffered)
    resident weights, and the f32 intermediates."""
    enc_in = tb * P * E * enc_bytes * enc_buffers          # streamed encoder tile
    dec_in = tb * D * enc_bytes * 2
    weights = (E * A + D * A) * w_bytes * 2                # W_enc, W_dec
    biases = (2 * A + 8) * 4 * 2                           # b_att, w_full, b_full (f32)
    inter = 3 * tb * P * A * 4                             # att1, relu(.), sw (f32)
    inter += tb * P * E * 4                                # f32 enc view for weighted sum
    outs = (tb * E + tb * P) * 4 * 2                       # awe + alpha blocks
    return int(1.15 * (enc_in + dec_in + weights + biases + inter + outs))


def _choose_tb(B, P, E, D, A, enc_bytes, w_bytes, enc_buffers, budget_bytes):
    """Largest batch tile that divides B, keeps 2-D blocks (8,128)-legal
    (tb % 8 == 0 or tb == B), and fits the per-generation VMEM budget."""
    candidates = [t for t in range(B, 0, -1)
                  if B % t == 0 and (t % 8 == 0 or t == B)]
    for t in candidates:
        if _estimate_vmem_bytes(t, P, E, D, A, enc_bytes, w_bytes,
                                enc_buffers) <= budget_bytes:
            return t
    return candidates[-1]


def attention_forward(encoder_out, decoder_hidden, params, *, tb=None,
                      storage_dtype=jnp.bfloat16, enc_buffers=None,
                      vmem_limit_bytes=None):
    """Forward pass. encoder_out: (B,P,E) f32, decoder_hidden: (B,D) f32.
    Returns (attention_weighted_encoding (B,E) f32, alpha (B,P) f32).

    storage_dtype is the dtype the encoder tile / hidden state / weights are
    stored and DMA'd in (cast here in the wrapper, NOT inside the kernel), so
    bf16 actually halves the dominant HBM traffic and doubles MXU throughput.
    Biases, relu/softmax and outputs stay f32."""
    B, P, E = encoder_out.shape
    D = decoder_hidden.shape[1]
    A = params["w_enc"].shape[1]

    vmem_phys = _tpu_vmem_bytes()
    # v5e/v6e (128 MiB VMEM, HBM-bound regime): 3 encoder buffers.
    # v7x (64 MiB VMEM, 3.2 TB/s HBM): keep depth 2, VMEM is the scarce resource.
    if enc_buffers is None:
        enc_buffers = 3 if vmem_phys >= (96 << 20) else 2
    budget = int(0.65 * vmem_phys)        # ~83 MiB on v5e/v6e, ~41 MiB on v7x

    enc_bytes = jnp.dtype(storage_dtype).itemsize
    if tb is None:
        tb = _choose_tb(B, P, E, D, A, enc_bytes, enc_bytes, enc_buffers, budget)
    assert B % tb == 0 and (tb % 8 == 0 or tb == B), \
        "tb must divide B and be a multiple of 8 (or equal B)"
    grid = (B // tb,)
    if grid[0] < enc_buffers:             # deeper pipeline than grid steps is pointless
        enc_buffers = 2

    est = _estimate_vmem_bytes(tb, P, E, D, A, enc_bytes, enc_bytes, enc_buffers)
    if vmem_limit_bytes is None:
        vmem_limit_bytes = int(min(max(est + (8 << 20), budget),
                                   int(0.95 * vmem_phys)))

    # Cast in the wrapper so the kernel DMAs the narrow dtype (bias stays f32).
    enc = encoder_out.astype(storage_dtype)
    dec = decoder_hidden.astype(storage_dtype)
    w_enc = params["w_enc"].astype(storage_dtype)
    w_dec = params["w_dec"].astype(storage_dtype)
    b_att = (params["b_enc"] + params["b_dec"]).astype(jnp.float32)   # folded (1, A)
    w_full = params["w_full"].astype(jnp.float32)                     # (1, A)
    b_full = params["b_full"].astype(jnp.float32)                     # (1, 1)

    def enc_idx(i):
        return (i, 0, 0)

    if enc_buffers != 2:
        try:
            enc_spec = pl.BlockSpec((tb, P, E), enc_idx,
                                    pipeline_mode=pl.Buffered(enc_buffers))
        except (TypeError, AttributeError):   # older jax without pipeline_mode
            enc_spec = pl.BlockSpec((tb, P, E), enc_idx)
    else:
        enc_spec = pl.BlockSpec((tb, P, E), enc_idx)

    fn = pl.pallas_call(
        attention_kernel,
        out_shape=(jax.ShapeDtypeStruct((B, E), jnp.float32),   # weighted encoding
                   jax.ShapeDtypeStruct((B, P), jnp.float32)),  # alpha
        grid=grid,
        in_specs=[
            enc_spec,                                       # encoder tile (streamed)
            pl.BlockSpec((tb, D), lambda i: (i, 0)),        # decoder hidden tile
            pl.BlockSpec((E, A), lambda i: (0, 0)),         # W_enc (resident)
            pl.BlockSpec((D, A), lambda i: (0, 0)),         # W_dec (resident)
            pl.BlockSpec((1, A), lambda i: (0, 0)),         # b_enc + b_dec (f32)
            pl.BlockSpec((1, A), lambda i: (0, 0)),         # w_full row (f32)
            pl.BlockSpec((1, 1), lambda i: (0, 0)),         # b_full (f32)
        ],
        out_specs=[
            pl.BlockSpec((tb, E), lambda i: (i, 0)),
            # TODO(synk): lane-pad alpha to round_up(P,128) for unmasked stores
            # when P % 128 != 0; skipped since alpha traffic is ~E x smaller than
            # the enc stream and P == full array dim keeps this block legal.
            pl.BlockSpec((tb, P), lambda i: (i, 0)),
        ],
        compiler_params=pltpu.CompilerParams(
            # Batch tiles are independent; on v7x, pltpu.CORE_PARALLEL on this
            # axis is the knob to force sharding across the 2 TensorCores.
            dimension_semantics=("parallel",),
            vmem_limit_bytes=int(vmem_limit_bytes),
        ),
    )
    return fn(enc, dec, w_enc, w_dec, b_att, w_full, b_full)


def init_params(key, encoder_dim, decoder_dim, attention_dim):
    """nn.Linear-style init (uniform +-1/sqrt(fan_in)); weights stored (in, out),
    full_att pre-transposed to a (1, attention_dim) row."""
    ks = jax.random.split(key, 6)

    def lin(kw, kb, fan_in, fan_out):
        bound = 1.0 / jnp.sqrt(fan_in)
        w = jax.random.uniform(kw, (fan_in, fan_out), jnp.float32, -bound, bound)
        b = jax.random.uniform(kb, (1, fan_out), jnp.float32, -bound, bound)
        return w, b

    w_enc, b_enc = lin(ks[0], ks[1], encoder_dim, attention_dim)
    w_dec, b_dec = lin(ks[2], ks[3], decoder_dim, attention_dim)
    bound = 1.0 / jnp.sqrt(attention_dim)
    w_full = jax.random.uniform(ks[4], (1, attention_dim), jnp.float32, -bound, bound)
    b_full = jax.random.uniform(ks[5], (1, 1), jnp.float32, -bound, bound)
    return dict(w_enc=w_enc, b_enc=b_enc, w_dec=w_dec, b_dec=b_dec,
                w_full=w_full, b_full=b_full)


def reference_forward(encoder_out, decoder_hidden, params):
    att1 = encoder_out @ params["w_enc"] + params["b_enc"][0]
    att2 = decoder_hidden @ params["w_dec"] + params["b_dec"][0]
    s = jnp.maximum(att1 + att2[:, None, :], 0.0)
    att = (s * params["w_full"][0]).sum(axis=-1) + params["b_full"][0, 0]
    alpha = jax.nn.softmax(att, axis=1)
    awe = (encoder_out * alpha[..., None]).sum(axis=1)
    return awe, alpha


if __name__ == "__main__":
    B, P = 16, 16                          # batch, num_pixels
    encoder_dim = decoder_dim = attention_dim = 32

    key = jax.random.PRNGKey(0)
    k_enc, k_dec, k_par = jax.random.split(key, 3)

    encoder_out = jax.random.normal(k_enc, (B, P, encoder_dim), jnp.float32)
    decoder_hidden = jax.random.normal(k_dec, (B, decoder_dim), jnp.float32)
    params = init_params(k_par, encoder_dim, decoder_dim, attention_dim)

    awe_gold, alpha_gold = reference_forward(encoder_out, decoder_hidden, params)

    # f32 storage, explicit 2-step grid (tb=8) -> exercises the pipelined batch
    # axis. Tolerance covers the TPU MXU's default f32 matmul precision and the
    # approx EUP reciprocal; structural bugs would show as O(0.1..1) errors.
    awe, alpha = attention_forward(encoder_out, decoder_hidden, params,
                                   tb=8, storage_dtype=jnp.float32)
    awe, alpha = jax.block_until_ready((awe, alpha))
    assert jnp.allclose(awe, awe_gold, atol=2e-2, rtol=2e-2), "awe mismatch (f32)"
    assert jnp.allclose(alpha, alpha_gold, atol=2e-2, rtol=2e-2), "alpha mismatch (f32)"

    # Default path: bf16 storage (halved enc HBM traffic, 2x MXU), auto tile size
    # from the per-generation VMEM budget; softmax/outputs stay f32.
    awe_bf, alpha_bf = attention_forward(encoder_out, decoder_hidden, params)
    awe_bf, alpha_bf = jax.block_until_ready((awe_bf, alpha_bf))
    assert jnp.allclose(awe_bf, awe_gold, atol=6e-2, rtol=6e-2), "awe mismatch (bf16)"
    assert jnp.allclose(alpha_bf, alpha_gold, atol=6e-2, rtol=6e-2), "alpha mismatch (bf16)"

    print("KERNEL_OK")
</pallas_src>

<mosaic_0001>
module attributes {stable_mosaic.version = 11 : i64} {
  func.func @attention_kernel(%arg0: i32, %arg1: memref<8x16x32xf32, #tpu.memory_space<vmem>>, %arg2: memref<8x32xf32, #tpu.memory_space<vmem>>, %arg3: memref<32x32xf32, #tpu.memory_space<vmem>>, %arg4: memref<32x32xf32, #tpu.memory_space<vmem>>, %arg5: memref<1x32xf32, #tpu.memory_space<vmem>>, %arg6: memref<1x32xf32, #tpu.memory_space<vmem>>, %arg7: memref<1x1xf32, #tpu.memory_space<vmem>>, %arg8: memref<8x32xf32, #tpu.memory_space<vmem>>, %arg9: memref<8x16xf32, #tpu.memory_space<vmem>>) attributes {dimension_semantics = [#tpu.dimension_semantics<parallel>], iteration_bounds = array<i64: 2>, scalar_prefetch = 0 : i64, scratch_operands = 0 : i64, tpu.core_type = #tpu.core_type<tc>, window_params = [{transform_indices = @transform_0, window_bounds = array<i64: 8, 16, 32>}, {transform_indices = @transform_1, window_bounds = array<i64: 8, 32>}, {pipeline_mode = #tpu.pipeline_mode<synchronous>, transform_indices = @transform_2, window_bounds = array<i64: 32, 32>}, {pipeline_mode = #tpu.pipeline_mode<synchronous>, transform_indices = @transform_3, window_bounds = array<i64: 32, 32>}, {pipeline_mode = #tpu.pipeline_mode<synchronous>, transform_indices = @transform_4, window_bounds = array<i64: 1, 32>}, {pipeline_mode = #tpu.pipeline_mode<synchronous>, transform_indices = @transform_5, window_bounds = array<i64: 1, 32>}, {pipeline_mode = #tpu.pipeline_mode<synchronous>, transform_indices = @transform_6, window_bounds = array<i64: 1, 1>}, {transform_indices = @transform_7, window_bounds = array<i64: 8, 32>}, {transform_indices = @transform_8, window_bounds = array<i64: 8, 16>}]} {
    %c0 = arith.constant 0 : index
    %c0_0 = arith.constant 0 : index
    %c0_1 = arith.constant 0 : index
    %0 = vector.load %arg1[%c0, %c0_0, %c0_1] : memref<8x16x32xf32, #tpu.memory_space<vmem>>, vector<8x16x32xf32>
    %1 = vector.shape_cast %0 : vector<8x16x32xf32> to vector<128x32xf32>
    %c0_2 = arith.constant 0 : index
    %c0_3 = arith.constant 0 : index
    %2 = vector.load %arg3[%c0_2, %c0_3] : memref<32x32xf32, #tpu.memory_space<vmem>>, vector<32x32xf32>
    %cst = arith.constant dense<0.000000e+00> : vector<128x32xf32>
    %3 = tpu.matmul %1, %2, %cst {dimension_numbers = #tpu.dot_dimension_numbers<[1], [0], [0], [1], [0, 0, 1, 1], [], []>} : vector<128x32xf32>, vector<32x32xf32>, vector<128x32xf32> -> vector<128x32xf32>
    %c0_4 = arith.constant 0 : index
    %c0_5 = arith.constant 0 : index
    %4 = vector.load %arg2[%c0_4, %c0_5] : memref<8x32xf32, #tpu.memory_space<vmem>>, vector<8x32xf32>
    %c0_6 = arith.constant 0 : index
    %c0_7 = arith.constant 0 : index
    %5 = vector.load %arg4[%c0_6, %c0_7] : memref<32x32xf32, #tpu.memory_space<vmem>>, vector<32x32xf32>
    %cst_8 = arith.constant dense<0.000000e+00> : vector<8x32xf32>
    %6 = tpu.matmul %4, %5, %cst_8 {dimension_numbers = #tpu.dot_dimension_numbers<[1], [0], [0], [1], [0, 0, 1, 1], [], []>} : vector<8x32xf32>, vector<32x32xf32>, vector<8x32xf32> -> vector<8x32xf32>
    %c0_9 = arith.constant 0 : index
    %c0_10 = arith.constant 0 : index
    %7 = vector.load %arg5[%c0_9, %c0_10] : memref<1x32xf32, #tpu.memory_space<vmem>>, vector<1x32xf32>
    %8 = vector.broadcast %7 : vector<1x32xf32> to vector<8x32xf32>
    %9 = arith.addf %6, %8 : vector<8x32xf32>
    %10 = vector.shape_cast %3 : vector<128x32xf32> to vector<8x16x32xf32>
    %11 = vector.shape_cast %9 : vector<8x32xf32> to vector<8x1x32xf32>
    %12 = vector.broadcast %11 : vector<8x1x32xf32> to vector<8x16x32xf32>
    %13 = arith.addf %10, %12 : vector<8x16x32xf32>
    %cst_11 = arith.constant 0.000000e+00 : f32
    %14 = vector.broadcast %cst_11 : f32 to vector<8x16x32xf32>
    %15 = arith.maximumf %13, %14 : vector<8x16x32xf32>
    %c0_12 = arith.constant 0 : index
    %c0_13 = arith.constant 0 : index
    %16 = vector.load %arg6[%c0_12, %c0_13] : memref<1x32xf32, #tpu.memory_space<vmem>>, vector<1x32xf32>
    %17 = vector.shape_cast %16 : vector<1x32xf32> to vector<1x1x32xf32>
    %18 = vector.broadcast %17 : vector<1x1x32xf32> to vector<8x16x32xf32>
    %19 = arith.mulf %15, %18 : vector<8x16x32xf32>
    %cst_14 = arith.constant dense<0.000000e+00> : vector<8x16xf32>
    %20 = vector.multi_reduction <add>, %19, %cst_14 [2] : vector<8x16x32xf32> to vector<8x16xf32>
    %c0_15 = arith.constant 0 : index
    %c0_16 = arith.constant 0 : index
    %21 = vector.load %arg7[%c0_15, %c0_16] : memref<1x1xf32, #tpu.memory_space<vmem>>, vector<1x1xf32>
    %22 = vector.broadcast %21 : vector<1x1xf32> to vector<8x16xf32>
    %23 = arith.addf %20, %22 : vector<8x16xf32>
    %cst_17 = arith.constant dense<0xFF800000> : vector<8xf32>
    %24 = vector.multi_reduction <maximumf>, %23, %cst_17 [1] : vector<8x16xf32> to vector<8xf32>
    %25 = vector.shape_cast %24 : vector<8xf32> to vector<8x1xf32>
    %26 = vector.broadcast %25 : vector<8x1xf32> to vector<8x16xf32>
    %27 = arith.subf %23, %26 : vector<8x16xf32>
    %28 = math.exp %27 : vector<8x16xf32>
    %cst_18 = arith.constant dense<0.000000e+00> : vector<8xf32>
    %29 = vector.multi_reduction <add>, %28, %cst_18 [1] : vector<8x16xf32> to vector<8xf32>
    %30 = vector.shape_cast %29 : vector<8xf32> to vector<8x1xf32>
    %31 = tpu.reciprocal %30 {approx = true} : vector<8x1xf32> -> vector<8x1xf32>
    %32 = vector.broadcast %31 : vector<8x1xf32> to vector<8x16xf32>
    %33 = arith.mulf %28, %32 : vector<8x16xf32>
    %c0_19 = arith.constant 0 : index
    %c0_20 = arith.constant 0 : index
    %34 = vector.load %arg9[%c0_19, %c0_20] : memref<8x16xf32, #tpu.memory_space<vmem>>, vector<8x16xf32>
    tpu.vector_store %arg9[%c0_19, %c0_20], %33 {strides = array<i32>} : memref<8x16xf32, #tpu.memory_space<vmem>>, vector<8x16xf32>,
    %cst_21 = arith.constant dense<0.000000e+00> : vector<8x16xf32>
    %35 = vector.multi_reduction <add>, %19, %cst_21 [2] : vector<8x16x32xf32> to vector<8x16xf32>
    %36 = vector.shape_cast %35 : vector<8x16xf32> to vector<8x16x1xf32>
    %cst_22 = arith.constant dense<0xFF800000> : vector<8x1xf32>
    %37 = vector.multi_reduction <maximumf>, %36, %cst_22 [1] : vector<8x16x1xf32> to vector<8x1xf32>
    %38 = vector.shape_cast %37 : vector<8x1xf32> to vector<8x1x1xf32>
    %39 = vector.broadcast %38 : vector<8x1x1xf32> to vector<8x16x1xf32>
    %40 = arith.subf %36, %39 : vector<8x16x1xf32>
    %41 = math.exp %40 : vector<8x16x1xf32>
    %cst_23 = arith.constant dense<0.000000e+00> : vector<8x1xf32>
    %42 = vector.multi_reduction <add>, %41, %cst_23 [1] : vector<8x16x1xf32> to vector<8x1xf32>
    %43 = vector.shape_cast %42 : vector<8x1xf32> to vector<8x1x1xf32>
    %44 = tpu.reciprocal %43 {approx = true} : vector<8x1x1xf32> -> vector<8x1x1xf32>
    %45 = vector.broadcast %44 : vector<8x1x1xf32> to vector<8x16x1xf32>
    %46 = arith.mulf %41, %45 : vector<8x16x1xf32>
    %47 = vector.broadcast %46 : vector<8x16x1xf32> to vector<8x16x32xf32>
    %48 = arith.mulf %0, %47 : vector<8x16x32xf32>
    %cst_24 = arith.constant dense<0.000000e+00> : vector<8x32xf32>
    %49 = vector.multi_reduction <add>, %48, %cst_24 [1] : vector<8x16x32xf32> to vector<8x32xf32>
    %c0_25 = arith.constant 0 : index
    %c0_26 = arith.constant 0 : index
    %50 = vector.load %arg8[%c0_25, %c0_26] : memref<8x32xf32, #tpu.memory_space<vmem>>, vector<8x32xf32>
    tpu.vector_store %arg8[%c0_25, %c0_26], %49 {strides = array<i32>} : memref<8x32xf32, #tpu.memory_space<vmem>>, vector<8x32xf32>,
    return
  }
  func.func @transform_0(%arg0: i32) -> (i32, i32, i32) {
    %c0_i32 = arith.constant 0 : i32
    %c0_i32_0 = arith.constant 0 : i32
    %c0_i32_1 = arith.constant 0 : i32
    return %arg0, %c0_i32, %c0_i32_0 : i32, i32, i32
  }
  func.func @transform_1(%arg0: i32) -> (i32, i32) {
    %c0_i32 = arith.constant 0 : i32
    %c0_i32_0 = arith.constant 0 : i32
    return %arg0, %c0_i32 : i32, i32
  }
  func.func @transform_2(%arg0: i32) -> (i32, i32) {
    %c0_i32 = arith.constant 0 : i32
    %c0_i32_0 = arith.constant 0 : i32
    %c0_i32_1 = arith.constant 0 : i32
    return %c0_i32, %c0_i32_0 : i32, i32
  }
  func.func @transform_3(%arg0: i32) -> (i32, i32) {
    %c0_i32 = arith.constant 0 : i32
    %c0_i32_0 = arith.constant 0 : i32
    %c0_i32_1 = arith.constant 0 : i32
    return %c0_i32, %c0_i32_0 : i32, i32
  }
  func.func @transform_4(%arg0: i32) -> (i32, i32) {
    %c0_i32 = arith.constant 0 : i32
    %c0_i32_0 = arith.constant 0 : i32
    %c0_i32_1 = arith.constant 0 : i32
    return %c0_i32, %c0_i32_0 : i32, i32
  }
  func.func @transform_5(%arg0: i32) -> (i32, i32) {
    %c0_i32 = arith.constant 0 : i32
    %c0_i32_0 = arith.constant 0 : i32
    %c0_i32_1 = arith.constant 0 : i32
    return %c0_i32, %c0_i32_0 : i32, i32
  }
  func.func @transform_6(%arg0: i32) -> (i32, i32) {
    %c0_i32 = arith.constant 0 : i32
    %c0_i32_0 = arith.constant 0 : i32
    %c0_i32_1 = arith.constant 0 : i32
    return %c0_i32, %c0_i32_0 : i32, i32
  }
  func.func @transform_7(%arg0: i32) -> (i32, i32) {
    %c0_i32 = arith.constant 0 : i32
    %c0_i32_0 = arith.constant 0 : i32
    return %arg0, %c0_i32 : i32, i32
  }
  func.func @transform_8(%arg0: i32) -> (i32, i32) {
    %c0_i32 = arith.constant 0 : i32
    %c0_i32_0 = arith.constant 0 : i32
    return %arg0, %c0_i32 : i32, i32
  }
}

</mosaic_0001>

<bundles_post_ra>
// kernel: tpu_custom_call.1
= control target key start
LH: loop header
LB: loop body
LE: loop exit
PB: predicated region body
PF: predicated region fallthrough
CT: control target
= control target key end

     0   :  { %s2880_s0 = inlined_call_operand.hbm [shape: f32[16,16,32], index: 0, kind: input, shape index: {}]   ;;  %s2881_s1 = inlined_call_operand.hbm [shape: f32[16,32], index: 1, kind: input, shape index: {}]   ;;  %s2882_s2 = inlined_call_operand.hbm [shape: f32[32,32], index: 2, kind: input, shape index: {}]   ;;  %s2883_s3 = inlined_call_operand.hbm [shape: f32[32,32], index: 3, kind: input, shape index: {}]   ;;  %s2884_s4 = inlined_call_operand.vmem [shape: f32[1,32], index: 4, kind: input, shape index: {}]   ;;  %s2885_s5 = inlined_call_operand.vmem [shape: f32[1,32], index: 5, kind: input, shape index: {}]   ;;  %s2886_s6 = inlined_call_operand.<no memory space> [shape: f32[1,1], index: 6, kind: input, shape index: {}]   ;;  %s2887_s7 = inlined_call_operand.hbm [shape: f32[16,32], index: 7, kind: output, shape index: {0}]   ;;  %s2888_s8 = inlined_call_operand.hbm [shape: f32[16,16], index: 8, kind: output, shape index: {1}]  }
   0x1   :  { %2900 = sst [smem:[#allocation29_spill]] %s2882_s2  ;;  %v14_v0 = vstv %s2886_s6 }
   0x2   :  { %2901 = sst [smem:[#allocation30_spill]] %s2883_s3  ;;  %15 = vst [vmem:[#allocation2] sm:$0x1] %v14_v0 }
   0x3   :  { %16 = vsyncpa [#allocation4], 0 }
   0x4   :  { %18 = vsyncpa [#allocation4 + $0x1], 0 }
   0x5   :  { %19 = vsyncpa [#allocation7], 0 }
   0x6   :  { %21 = vsyncpa [#allocation7 + $0x1], 0 }
   0x7   :  { %22 = vsyncpa [#allocation10], 0 }
   0x8   :  { %23 = vsyncpa [#allocation5], 0 }
   0x9   :  { %25 = vsyncpa [#allocation5 + $0x1], 0 }
   0xa   :  { %26 = vsyncpa [#allocation13], 0 }
   0xb   :  { %28 = vsyncpa [#allocation13 + $0x1], 0  ;;  %s2061_s29 = smov 0   ;;  %s2063_s30 = smov 0  }
   0xc   :  { %s2065_s9 = smov 0   ;;  %s2067_s10 = smov 0  }
   0xd LB: > { %2902 = sst [smem:[#allocation20_spill]] %s2002_s9  ;;  %s2082_s6 = sadd.s32 4294967295, %s2006_s10   ;;  %s2006_s10 = sphi %s2067_s10, %s2927_s10   ;;  %s2002_s9 = sphi %s2065_s9, %s2929_s9   ;;  %s1998_s30 = sphi %s2063_s30, %s2931_s30   ;;  %s1994_s29 = sphi %s2061_s29, %s2930_s29  }
   0xe   : > { %s1553_s11 = sadd.s32 4294967294, %s2006_s10   ;;  %p54_p0 = scmp.ne.s32.totalorder %s1998_s30, %s1994_s29 }
   0xf   : > { %p55_p1 = scmp.eq.s32.totalorder %s2082_s6, 0  ;;  %p209_p2 = scmp.eq.s32.totalorder %s2082_s6, 1 }
  0x10   : > { %p215_p3 = scmp.eq.s32.totalorder %s1553_s11, 1  ;;  %p1554_p5 = scmp.ge.s32.totalorder %s2006_s10, 1 }
  0x11   : > { %p2091_p4 = por %p55_p1, %p54_p0  ;;  %p248_p7 = scmp.lt.s32.totalorder %s2006_s10, 3 }
  0x12   : > { %p2096_p6 = por %p215_p3, %p54_p0  ;;  %s2906_s2 = sld [smem:[#allocation29_spill]] }
  0x13   : > { %p2104_p8 = pnand %p1554_p5, %p248_p7  ;;  %s2008_s18 = smov [#allocation8]  }
  0x14   : > { %s2904_s13 = scalar_select %p2096_p6, 1, 0 }
  0x15   : > { %p1624_p9 = pneg %p2104_p8  ;;  %s261_s19 = sshll.u32 %s2008_s18, 4  ;;  %s262_s19 = int_to_ptr.vmem [resolvable:$true] %s261_s19 }
  0x16   : > { %2905 = sst [smem:[#allocation21_spill]] %s2904_s13  ;;  %s2889_s23 = smov 128  }
  0x17   : > { %p1625_p10 = pnand %p1624_p9, %p55_p1  ;;  %s2908_s3 = sld [smem:[#allocation30_spill]] }
  0x18   : > { %s259_s16 = sshll.u32 %s2906_s2, 4  ;;  %s2890_s24 = smov 8   ;;  %s260_s16 = int_to_ptr.hbm [resolvable:$true] %s259_s16 }
  0x19   : > { %1627 = dma.hbm_to_vmem [thread:$0]  (!%p1625_p10), %s260_s16, 512, %s262_s19, [#allocation7], %s2889_s23, %s2889_s23, %s2890_s24  }
  0x1a   : > { %s2011_s25 = smov [#allocation9]   ;;  %s2123_s27 = sadd.s32 1, %s2006_s10  }
  0x1b   : > { %s275_s26 = sshll.u32 %s2011_s25, 4  ;;  %2909 = sst [smem:[#allocation22_spill]] %s2123_s27  ;;  %s276_s26 = int_to_ptr.vmem [resolvable:$true] %s275_s26 }
  0x1c   : > { %s41_s28 = sadd.s32 1, %s2002_s9  ;;  %s38_s11 = ssub.s32 %s2006_s10, %s2123_s27 }
  0x1d   : > { %s273_s22 = sshll.u32 %s2908_s3, 4  ;;  %p48_p12 = scmp.ne.s32.totalorder %s2002_s9, %s1998_s30  ;;  %s274_s22 = int_to_ptr.hbm [resolvable:$true] %s273_s22 }
  0x1e   : > { %1630 = dma.hbm_to_vmem [thread:$0]  (!%p1625_p10), %s274_s22, 512, %s276_s26, [#allocation10], %s2889_s23, %s2889_s23, %s2890_s24  }
  0x1f   : > { %p39_p13 = scmp.eq.s32.totalorder %s38_s11, 0  ;;  %p49_p0 = scmp.eq.s32.totalorder %s2006_s10, 0 }
  0x20   : > { %p2133_p3 = por %p209_p2, %p48_p12  ;;  %p1647_p5 = scmp.lt.s32.totalorder %s2006_s10, 2 }
  0x21   : > { %s2139_s15 = scalar_select %p39_p13, %s2002_s9, %s41_s28  }
  0x22   : > { %p50_p7 = por %p49_p0, %p48_p12  ;;  %s2142_s16 = sand.u32 1, %s2002_s9  }
  0x23   : > { %2911 = sst [smem:[#allocation23_spill]] %s2139_s15  ;;  %s1558_s18 = sshll.u32 %s2142_s16, 7 }
  0x24   : > { %s1595_s19 = sshll.u32 %s2006_s10, 7  ;;  %s302_s25 = scalar_lea.vmem [#allocation3], %s1558_s18 }
  0x25   : > { %s308_s22 = scalar_lea.hbm %s2880_s0, %s1595_s19  ;;  %s311_s26 = sshll.u32 %s302_s25, 4  ;;  %s312_s26 = int_to_ptr.vmem [resolvable:$true] %s311_s26 }
  0x26   : > { %s309_s11 = sshll.u32 %s308_s22, 4  ;;  %p2149_p2 = pnand %p1647_p5, %p50_p7  ;;  %s310_s11 = int_to_ptr.hbm [resolvable:$true] %s309_s11 }
  0x27   : > { %s321_s23 = sand.u32 1, %s2006_s10   ;;  %s1562_s24 = sshll.u32 %s2142_s16, 3 }
  0x28   : > { %s299_s2 = scalar_lea.sflag [#allocation4], %s2142_s16  ;;  %s1836_s3 = sshra.s32 %s310_s11, 4  ;;  %s1837_s3 = int_to_ptr.hbm [resolvable:$true] %s1836_s3 }
  0x29   : > { %s1838_s15 = scalar_lea.hbm %s1837_s3, 128  ;;  %p1840_p10 = pneg %p2149_p2 }
  0x2a   : > { %p1839_p9 = scmp.ne.s32.totalorder %s1837_s3, %s1838_s15  ;;  %s1843_s20 = scalar_lea.hbm %s2880_s0, 256 }
  0x2b   : > { %p1844_p0 = scmp.lt.s32.totalorder %s1837_s3, %s2880_s0  ;;  %p1845_p5 = scmp.lt.s32.totalorder %s1843_s20, %s1838_s15 }
  0x2c   : > { %p1841_p12 = pnand %p1840_p10, %p1839_p9 }
  0x2d   : > { %p1846_p7 = por %p1845_p5, %p1844_p0 }
  0x2e   : > { %p1842_p13 = pneg %p1841_p12 }
  0x30   : > { %p1847_p11 = pnand %p1846_p7, %p1842_p13 }
  0x32   : > { %1850 = shalt.err (!%p1847_p11)
}
  0x33   : > { %s2913_s16 = smov 8   ;;  %s2914_s25 = smov 128  }
  0x34   : > { %1634 = dma.hbm_to_vmem [thread:$0]  (!%p2149_p2), %s310_s11, 2048, %s312_s26, %s299_s2, %s2914_s25, %s2914_s25, %s2913_s16  }
  0x35   : > { %s1563_s9 = sshll.u32 %s2006_s10, 3  ;;  %s325_s13 = scalar_lea.vmem [#allocation6], %s1562_s24 }
  0x36   : > { %s329_s19 = scalar_lea.hbm %s2881_s1, %s1563_s9  ;;  %s333_s21 = sshll.u32 %s325_s13, 4  ;;  %s334_s21 = int_to_ptr.vmem [resolvable:$true] %s333_s21 }
  0x37   : > { %s331_s3 = sshll.u32 %s329_s19, 4  ;;  %s322_s15 = scalar_lea.sflag [#allocation7], %s321_s23  ;;  %s332_s3 = int_to_ptr.hbm [resolvable:$true] %s331_s3 }
  0x38   : > { %s1866_s20 = sshra.s32 %s332_s3, 4  ;;  %s1873_s11 = scalar_lea.hbm %s2881_s1, 16  ;;  %s1867_s20 = int_to_ptr.hbm [resolvable:$true] %s1866_s20 }
  0x39   : > { %s1868_s22 = scalar_lea.hbm %s1867_s20, 8  ;;  %p1874_p13 = scmp.lt.s32.totalorder %s1867_s20, %s2881_s1 }
  0x3a   : > { %p1869_p11 = scmp.ne.s32.totalorder %s1867_s20, %s1868_s22  ;;  %p1875_p0 = scmp.lt.s32.totalorder %s1873_s11, %s1868_s22 }
  0x3c   : > { %p1871_p9 = pnand %p1869_p11, %p1840_p10  ;;  %p1876_p5 = por %p1875_p0, %p1874_p13 }
  0x3e   : > { %p1872_p12 = pneg %p1871_p9 }
  0x40   : > { %p1877_p7 = pnand %p1876_p5, %p1872_p12 }
  0x42   : > { %1880 = shalt.err (!%p1877_p7)
}
  0x43   : > { %1637 = dma.hbm_to_vmem [thread:$0]  (!%p2149_p2), %s332_s3, 128, %s334_s21, %s322_s15  }
  0x44   : > { %342 = sbr.rel (%p2104_p8) target bundleno = 1046 (0x416), region = 48 }
  0x49   : > { %s2190_s13 = sand.u32 1, %s1998_s30  }
  0x4a   : > { %s1565_s23 = sshll.u32 %s2190_s13, 7  ;;  %s345_s24 = scalar_lea.sflag [#allocation4], %s2190_s13 }
  0x4b   : > { %s2194_s16 = scalar_lea.vmem [#allocation3], %s1565_s23 }
  0x4c   : > { %1969 = dma.done.wait (%p2091_p4), %s345_s24, 2048  }
  0x4d   : > { %1971 = vsyncadd (%p2091_p4), %s345_s24, 4294965248  ;;  %s354_s17 = sand.u32 1, %s2082_s6   ;;  %s2202_s28 = sshll.u32 %s2190_s13, 3 }
  0x4e   : > { %s355_s25 = scalar_lea.sflag [#allocation7], %s354_s17  ;;  %s358_s18 = scalar_lea.vmem [#allocation6], %s2202_s28 }
  0x4f   : > { %1973 = dma.done.wait (%p2091_p4), %s355_s25, 128  }
  0x50   : > { %1975 = vsyncadd (%p2091_p4), %s355_s25, 4294967168 }
  0x51   : > { %1977 = dma.done.wait (%p55_p1), [#allocation7], 512  }
  0x52   : > { %1979 = vsyncadd (%p55_p1), [#allocation7], 4294966784 }
  0x53   : > { %1981 = dma.done.wait (%p55_p1), [#allocation10], 512  }
  0x54   : > { %1983 = vsyncadd (%p55_p1), [#allocation10], 4294966784  ;;  %v432_v1 = vld [vmem:[#allocation8 + $0x18] sm:$0xff]  ;;  %v431_v2 = vld [vmem:[#allocation8 + $0x10] sm:$0xff]  ;;  %vm433_vm0 = vcmask 261120   ;;  %vm747_vm1 = vcmask 130112  }
  0x55   : > { %494 = vmatpush.msra.mxu0 %v432_v1  ;;  %1596 = vmatpush.msra.mxu1 %v432_v1  ;;  %v430_v3 = vld [vmem:[#allocation8 + $0x8] sm:$0xff]  ;;  %v429_v4 = vld [vmem:[#allocation8] sm:$0xff]  ;;  %v2218_v5 = vld [vmem:[%s2194_s16] sm:$0xff]  ;;  %vm770_vm2 = vcmask 1041409   ;;  %vm772_vm3 = vcmask 1042434   ;;  %vm774_vm4 = vcmask 1043459  }
  0x56   : > { %1597 = vmatpush.msra.mxu2 %v432_v1  ;;  %1598 = vmatpush.msra.mxu3 %v432_v1  ;;  %v2221_v6 = vld [vmem:[%s2194_s16 + $0x20] sm:$0xff]  ;;  %v2224_v7 = vld [vmem:[%s2194_s16 + $0x30] sm:$0xff]  ;;  %v2227_v8 = vld [vmem:[%s2194_s16 + $0x58] sm:$0xff]  ;;  %vm776_vm5 = vcmask 1044484   ;;  %vm778_vm6 = vcmask 1045509   ;;  %vm780_vm7 = vcmask 1046534  }
  0x57   : > { %495 = vmatpush.msra.mxu0 %v431_v2  ;;  %1599 = vmatpush.msra.mxu1 %v431_v2  ;;  %2915 = vst [vmem:[#allocation24_spill] sm:$0xff] %v2227_v8  ;;  %v551_v9 = vld [vmem:[#allocation9 + $0x18] sm:$0xff]  ;;  %v550_v10 = vld [vmem:[#allocation9 + $0x10] sm:$0xff]  ;;  %v549_v11 = vld [vmem:[#allocation9 + $0x8] sm:$0xff]  ;;  %vm782_vm8 = vcmask 1047559   ;;  %vm785_vm9 = vcmask 130048  }
  0x58   : > { %1600 = vmatpush.msra.mxu2 %v431_v2  ;;  %1601 = vmatpush.msra.mxu3 %v431_v2  ;;  %v2238_v12 = vld [vmem:[%s2194_s16 + $0x8] sm:$0xff]  ;;  %v2244_v14 = vld [vmem:[%s2194_s16 + $0x38] sm:$0xff]  ;;  %v2247_v15 = vld [vmem:[%s2194_s16 + $0x60] sm:$0xff]  ;;  %s404_s15 = scalar_lea.vmem [#allocation11], %s2202_s28  ;;  %s1590_s20 = sshll.u32 %s2082_s6, 3 }
  0x59   : > { %496 = vmatpush.msra.mxu0 %v430_v3  ;;  %1602 = vmatpush.msra.mxu1 %v430_v3  ;;  %v2241_v13 = vld [vmem:[%s2194_s16 + $0x28] sm:$0xff]  ;;  %v548_v16 = vld [vmem:[#allocation9] sm:$0xff]  ;;  %v2263_v19 = vld [vmem:[%s2194_s16 + $0x40] sm:$0xff]  ;;  %s1389_s26 = scalar_lea.hbm %s2887_s7, %s1590_s20  ;;  %s1391_s11 = sshll.u32 %s404_s15, 4  ;;  %s1392_s11 = int_to_ptr.vmem [resolvable:$true] %s1391_s11 }
  0x5a   : > { %1603 = vmatpush.msra.mxu2 %v430_v3  ;;  %1604 = vmatpush.msra.mxu3 %v430_v3  ;;  %v2258_v17 = vld [vmem:[%s2194_s16 + $0x10] sm:$0xff]  ;;  %v547_v18 = vld [vmem:[%s358_s18] sm:$0xff]  ;;  %v2276_v21 = vld [vmem:[%s2194_s16 + $0x18] sm:$0xff]  ;;  %s1393_s27 = sshll.u32 %s1389_s26, 4  ;;  %s1374_s9 = scalar_lea.sflag [#allocation5], %s2190_s13  ;;  %s1394_s27 = int_to_ptr.hbm [resolvable:$true] %s1393_s27 }
  0x5b   : > { %497 = vmatpush.msra.mxu0 %v429_v4  ;;  %1605 = vmatpush.msra.mxu1 %v429_v4  ;;  %v2266_v20 = vld [vmem:[%s2194_s16 + $0x68] sm:$0xff]  ;;  %v2282_v23 = vld [vmem:[%s2194_s16 + $0x70] sm:$0xff]  ;;  %v2294_v25 = vld [vmem:[%s2194_s16 + $0x78] sm:$0xff]  ;;  %s1910_s23 = sshra.s32 %s1394_s27, 4  ;;  %s1916_s25 = scalar_lea.hbm %s2887_s7, 16  ;;  %s1911_s23 = int_to_ptr.hbm [resolvable:$true] %s1910_s23 }
  0x5c   : > { %1606 = vmatpush.msra.mxu2 %v429_v4  ;;  %1607 = vmatpush.msra.mxu3 %v429_v4  ;;  %v2279_v22 = vld [vmem:[%s2194_s16 + $0x48] sm:$0xff]  ;;  %2916 = vst [vmem:[#allocation25_spill] sm:$0xff] %v2282_v23  ;;  %v2291_v24 = vld [vmem:[%s2194_s16 + $0x50] sm:$0xff]  ;;  %v1691_v32 = vld [vmem:[%s2884_s4] ss:$0 sm:$0xff]  ;;  %s1912_s24 = scalar_lea.hbm %s1911_s23, 8  ;;  %p1917_p2 = scmp.lt.s32.totalorder %s1911_s23, %s2887_s7 }
  0x5d   : > { %1571 = vmatmul.msk.f32.vlgmr.msra.gmra.mxu0 %vm433_vm0, %v2218_v5  ;;  %1575 = vmatmul.msk.f32.vlgmr.msra.gmra.mxu1 %vm433_vm0, %v2221_v6  ;;  %2917 = vst [vmem:[#allocation26_spill] sm:$0xff] %v2294_v25  ;;  %v2314_v43 = vld [vmem:[%s2885_s5] ss:$0 sm:$0xff]  ;;  %p1913_p1 = scmp.ne.s32.totalorder %s1911_s23, %s1912_s24  ;;  %p1918_p10 = scmp.lt.s32.totalorder %s1916_s25, %s1912_s24 }
  0x5e   : > { %1577 = vmatmul.msk.f32.vlgmr.msra.gmra.mxu2 %vm433_vm0, %v2224_v7  ;;  %1582 = vmatmul.msk.f32.vlgmr.msra.gmra.mxu3 %vm433_vm0, %v2227_v8 }
  0x5f   : > { %571 = vmatpush.msrb.mxu1 %v551_v9  ;;  %p1914_p4 = pnand %p1913_p1, %p2133_p3  ;;  %p1919_p11 = por %p1918_p10, %p1917_p2 }
  0x61   : > { %572 = vmatpush.msrb.mxu1 %v550_v10  ;;  %p1915_p8 = pneg %p1914_p4 }
  0x63   : > { %573 = vmatpush.msrb.mxu1 %v549_v11  ;;  %p1920_p9 = pnand %p1919_p11, %p1915_p8 }
  0x65   : > { %1572 = vmatmul.msk.f32.gmra.mxu0 %vm433_vm0, %v2238_v12  ;;  %1576 = vmatmul.msk.f32.gmra.mxu1 %vm433_vm0, %v2241_v13 }
  0x66   : > { %1578 = vmatmul.msk.f32.gmra.mxu2 %vm433_vm0, %v2244_v14  ;;  %1583 = vmatmul.msk.f32.gmra.mxu3 %vm433_vm0, %v2247_v15 }
  0x67   : > { %574 = vmatpush.msrb.mxu1 %v548_v16 }
  0x6d   : > { %1573 = vmatmul.msk.f32.gmra.mxu0 %vm433_vm0, %v2258_v17  ;;  %1587 = vmatmul.msk.f32.vlgmr.msrb.gmra.mxu1 %vm433_vm0, %v547_v18 }
  0x6e   : > { %1579 = vmatmul.msk.f32.gmra.mxu2 %vm433_vm0, %v2263_v19  ;;  %1584 = vmatmul.msk.f32.gmra.mxu3 %vm433_vm0, %v2266_v20 }
  0x75   : > { %1574 = vmatmul.msk.f32.gmra.mxu0 %vm433_vm0, %v2276_v21 }
  0x76   : > { %1580 = vmatmul.msk.f32.gmra.mxu2 %vm433_vm0, %v2279_v22  ;;  %1585 = vmatmul.msk.f32.gmra.mxu3 %vm433_vm0, %v2282_v23 }
  0x7e   : > { %1581 = vmatmul.msk.f32.gmra.mxu2 %vm433_vm0, %v2291_v24  ;;  %1586 = vmatmul.msk.f32.gmra.mxu3 %vm433_vm0, %v2294_v25 }
  0xda   : > { %v511_v26 = vpop.f32.mrf.mxu1  ;;  %v499_v27 = vpop.f32.mrf.mxu0 }
  0xe1   : > { %v517_v28 = vpop.f32.mrf.mxu2  ;;  %v2300_v30 = vpop.f32.mrf.mxu3 }
  0xe2   : > { %v514_v29 = vpop.f32.mrf.mxu1  ;;  %v502_v31 = vpop.f32.mrf.mxu0 }
  0xe9   : > { %v520_v33 = vpop.f32.mrf.mxu2  ;;  %v535_v38 = vpop.f32.mrf.mxu3 }
  0xea   : > { %v576_v34 = vpop.f32.mrf.mxu1  ;;  %v505_v44 = vpop.f32.mrf.mxu0 }
  0xeb   : > { %v2305_v35 = vadd.f32 %v1691_v32, %v576_v34 }
  0xed   : > { %v580_v36 = vrot.slane %v2305_v35, 1  ;;  %v587_v37 = vperm.slane %v2305_v35, 0  ;;  %v581_v39 = vrot.slane %v2305_v35, 2  ;;  %v582_v40 = vrot.slane %v2305_v35, 3 }
  0xee   : > { %v585_v51 = vrot.slane %v2305_v35, 6  ;;  %v583_v55 = vrot.slane %v2305_v35, 4 }
  0xef   : > { %v588_v41 = vperm.slane %v580_v36, 0  ;;  %v603_v42 = vadd.f32 %v587_v37, %v499_v27  ;;  %v589_v45 = vperm.slane %v581_v39, 0  ;;  %v604_v48 = vadd.f32 %v587_v37, %v502_v31 }
  0xf0   : > { %v590_v50 = vperm.slane %v582_v40, 0  ;;  %v593_v63 = vperm.slane %v585_v51, 0  ;;  %v591_v1 = vperm.slane %v583_v55, 0  ;;  %v584_v27 = vrot.slane %v2305_v35, 5 }
  0xf1   : > { %v619_v46 = vmax.f32 %v603_v42, 0.0  ;;  %v605_v47 = vadd.f32 %v588_v41, %v505_v44  ;;  %v607_v49 = vadd.f32 %v589_v45, %v511_v26  ;;  %v523_v54 = vpop.f32.mrf.mxu2  ;;  %v620_v59 = vmax.f32 %v604_v48, 0.0  ;;  %v538_v2 = vpop.f32.mrf.mxu3 }
  0xf2   : > { %v608_v60 = vadd.f32 %v589_v45, %v514_v29  ;;  %v610_v62 = vadd.f32 %v590_v50, %v520_v33  ;;  %v609_v11 = vadd.f32 %v590_v50, %v517_v28  ;;  %v616_v16 = vadd.f32 %v593_v63, %v538_v2  ;;  %v508_v39 = vpop.f32.mrf.mxu0 }
  0xf3   : > { %v639_v52 = vmul.f32 %v2314_v43, %v619_v46  ;;  %v621_v53 = vmax.f32 %v605_v47, 0.0  ;;  %v623_v56 = vmax.f32 %v607_v49, 0.0  ;;  %v640_v10 = vmul.f32 %v2314_v43, %v620_v59 }
  0xf4   : > { %v624_v4 = vmax.f32 %v608_v60, 0.0  ;;  %v626_v9 = vmax.f32 %v610_v62, 0.0  ;;  %v611_v26 = vadd.f32 %v591_v1, %v523_v54  ;;  %v625_v32 = vmax.f32 %v609_v11, 0.0 }
  0xf5   : > { %v655_v57 = vsel %vm433_vm0, %v639_v52, 0.0  ;;  %v641_v58 = vmul.f32 %v2314_v43, %v621_v53  ;;  %v643_v61 = vmul.f32 %v2314_v43, %v623_v56  ;;  %v658_v31 = vsel %vm433_vm0, %v640_v10, 0.0 }
  0xf6   : > { %656 = vadd.xlane.f32.xlu0 %v655_v57  ;;  %v646_v18 = vmul.f32 %v2314_v43, %v626_v9  ;;  %v644_v29 = vmul.f32 %v2314_v43, %v624_v4  ;;  %v632_v34 = vmax.f32 %v616_v16, 0.0  ;;  %v627_v37 = vmax.f32 %v611_v26, 0.0 }
  0xf7   : > { %v661_v0 = vsel %vm433_vm0, %v641_v58, 0.0  ;;  %v667_v3 = vsel %vm433_vm0, %v643_v61, 0.0  ;;  %v592_v40 = vperm.slane %v584_v27, 0  ;;  %v615_v42 = vadd.f32 %v593_v63, %v535_v38 }
  0xf8   : > { %662 = vadd.xlane.f32.xlu1 %v661_v0  ;;  %668 = vadd.xlane.f32.xlu2 %v667_v3  ;;  %v676_v36 = vsel %vm433_vm0, %v646_v18, 0.0  ;;  %v670_v28 = vsel %vm433_vm0, %v644_v29, 0.0  ;;  %v645_v44 = vmul.f32 %v2314_v43, %v625_v32  ;;  %v2012_v45 = vmov 0  }
  0xf9   : > { %v526_v33 = vpop.f32.mrf.mxu2  ;;  %1690 = vset.pattern.permute.xlu0 %v2012_v45  ;;  %1688 = vset.pattern.permute.xlu2 %v2012_v45  ;;  %v606_v46 = vadd.f32 %v588_v41, %v508_v39  ;;  %v652_v47 = vmul.f32 %v2314_v43, %v632_v34  ;;  %v614_v48 = vadd.f32 %v592_v40, %v2300_v30  ;;  %v631_v51 = vmax.f32 %v615_v42, 0.0  ;;  %v541_v52 = vpop.f32.mrf.mxu3 }
  0xfa   : > { %1689 = vset.pattern.permute.xlu1 %v2012_v45  ;;  %v647_v49 = vmul.f32 %v2314_v43, %v627_v37  ;;  %v673_v50 = vsel %vm433_vm0, %v645_v44, 0.0  ;;  %v612_v41 = vadd.f32 %v591_v1, %v526_v33  ;;  %v586_v30 = vrot.slane %v2305_v35, 7  ;;  %v1693_v33 = vld [vmem:[#allocation2] ss:$0 sm:$0xff] }
  0xfb   : > { %v622_v38 = vmax.f32 %v606_v46, 0.0  ;;  %v694_v53 = vsel %vm433_vm0, %v652_v47, 0.0  ;;  %v630_v56 = vmax.f32 %v614_v48, 0.0  ;;  %v651_v57 = vmul.f32 %v2314_v43, %v631_v51 }
  0xfc   : > { %v679_v55 = vsel %vm433_vm0, %v647_v49, 0.0  ;;  %v628_v61 = vmax.f32 %v612_v41, 0.0  ;;  %v594_v63 = vperm.slane %v586_v30, 0 }
  0xfd   : > { %v642_v59 = vmul.f32 %v2314_v43, %v622_v38  ;;  %v650_v60 = vmul.f32 %v2314_v43, %v630_v56  ;;  %v691_v62 = vsel %vm433_vm0, %v651_v57, 0.0 }
  0xfe   : > { %659 = vadd.xlane.f32.xlu0 %v658_v31  ;;  %v617_v4 = vadd.f32 %v594_v63, %v541_v52  ;;  %v648_v35 = vmul.f32 %v2314_v43, %v628_v61 }
  0xff   : > { %v664_v2 = vsel %vm433_vm0, %v642_v59, 0.0  ;;  %v688_v1 = vsel %vm433_vm0, %v650_v60, 0.0 }
 0x100   : > { %677 = vadd.xlane.f32.xlu1 %v676_v36  ;;  %671 = vadd.xlane.f32.xlu2 %v670_v28  ;;  %v633_v11 = vmax.f32 %v617_v4, 0.0  ;;  %v682_v16 = vsel %vm433_vm0, %v648_v35, 0.0 }
 0x101   : > { %v529_v54 = vpop.f32.mrf.mxu2  ;;  %v544_v3 = vpop.f32.mrf.mxu3 }
 0x102   : > { %v613_v58 = vadd.f32 %v592_v40, %v529_v54  ;;  %v618_v9 = vadd.f32 %v594_v63, %v544_v3  ;;  %v653_v27 = vmul.f32 %v2314_v43, %v633_v11 }
 0x104   : > { %v629_v0 = vmax.f32 %v613_v58, 0.0  ;;  %v634_v18 = vmax.f32 %v618_v9, 0.0  ;;  %v697_v31 = vsel %vm433_vm0, %v653_v27, 0.0 }
 0x106   : > { %674 = vadd.xlane.f32.xlu0 %v673_v50  ;;  %v649_v10 = vmul.f32 %v2314_v43, %v629_v0  ;;  %v654_v29 = vmul.f32 %v2314_v43, %v634_v18 }
 0x108   : > { %695 = vadd.xlane.f32.xlu1 %v694_v53  ;;  %680 = vadd.xlane.f32.xlu2 %v679_v55  ;;  %v685_v26 = vsel %vm433_vm0, %v649_v10, 0.0  ;;  %v700_v32 = vsel %vm433_vm0, %v654_v29, 0.0 }
 0x10e   : > { %692 = vadd.xlane.f32.xlu0 %v691_v62 }
 0x110   : > { %665 = vadd.xlane.f32.xlu1 %v664_v2  ;;  %689 = vadd.xlane.f32.xlu2 %v688_v1 }
 0x116   : > { %683 = vadd.xlane.f32.xlu0 %v682_v16 }
 0x118   : > { %686 = vadd.xlane.f32.xlu1 %v685_v26 }
 0x11e   : > { %698 = vadd.xlane.f32.xlu0 %v697_v31 }
 0x120   : > { %701 = vadd.xlane.f32.xlu1 %v700_v32 }
 0x128   : > { %707 = vperm.xlu2 %1688, %v1693_v33  }
 0x169   : > { %v2353_v34 = vpop.xlane.xlu0 %656 }
 0x16b   : > { %v2355_v36 = vpop.xlane.xlu1 %662  ;;  %v2357_v37 = vpop.xlane.xlu2 %668 }
 0x171   : > { %v2359_v39 = vpop.xlane.xlu0 %659 }
 0x172   : > { %v1084_v40 = vmax.f32 %v2353_v34, %v2359_v39 }
 0x173   : > { %v2363_v43 = vpop.xlane.xlu1 %677  ;;  %v2365_v42 = vpop.xlane.xlu2 %671 }
 0x174   : > { %v1085_v28 = vrot.slane %v1084_v40, 4  ;;  %v1098_v44 = vmax.f32 %v2357_v37, %v2365_v42 }
 0x176   : > { %v1086_v45 = vmax.f32 %v1084_v40, %v1085_v28  ;;  %v1099_v46 = vrot.slane %v1098_v44, 4 }
 0x178   : > { %v1087_v47 = vrot.slane %v1086_v45, 2  ;;  %v1100_v48 = vmax.f32 %v1098_v44, %v1099_v46 }
 0x179   : > { %v2369_v49 = vpop.xlane.xlu0 %674 }
 0x17a   : > { %v1088_v50 = vmax.f32 %v1086_v45, %v1087_v47  ;;  %v1105_v51 = vmax.f32 %v2369_v49, %v2363_v43  ;;  %v1101_v52 = vrot.slane %v1100_v48, 2 }
 0x17b   : > { %v2373_v38 = vpop.xlane.xlu1 %695  ;;  %v2379_v2 = vpop.xlane.xlu2 %680 }
 0x17c   : > { %2918 = vst [vmem:[#allocation27_spill] sm:$0xff] %v2373_v38  ;;  %v1089_v53 = vrot.slane %v1088_v50, 1  ;;  %v1106_v54 = vrot.slane %v1105_v51, 4  ;;  %v1102_v55 = vmax.f32 %v1100_v48, %v1101_v52 }
 0x17e   : > { %v1090_v56 = vmax.f32 %v1088_v50, %v1089_v53  ;;  %v1107_v41 = vmax.f32 %v1105_v51, %v1106_v54  ;;  %v1103_v57 = vrot.slane %v1102_v55, 1 }
 0x180   : > { %v1140_v30 = vsub.f32 %v2353_v34, %v1090_v56  ;;  %v1141_v58 = vsub.f32 %v2359_v39, %v1090_v56  ;;  %v1108_v59 = vrot.slane %v1107_v41, 2  ;;  %v1104_v60 = vmax.f32 %v1102_v55, %v1103_v57 }
 0x181   : > { %v2377_v61 = vpop.xlane.xlu0 %692 }
 0x182   : > { %2919 = vst [vmem:[#allocation28_spill] sm:$0xff] %v2377_v61  ;;  %v1156_v62 = vmul.f32 1.442695, %v1140_v30  ;;  %v1158_v63 = vmul.f32 1.442695, %v1141_v58  ;;  %v1109_v0 = vmax.f32 %v1107_v41, %v1108_v59  ;;  %v1126_v3 = vmax.f32 %v2377_v61, %v2373_v38 }
 0x183   : > { %v1144_v1 = vsub.f32 %v2357_v37, %v1104_v60  ;;  %v1145_v4 = vsub.f32 %v2365_v42, %v1104_v60  ;;  %v2385_v35 = vpop.xlane.xlu1 %665  ;;  %v2403_v55 = vpop.xlane.xlu2 %689 }
 0x184   : > { %1694 = vpow2.f32 %v1156_v62  ;;  %v1110_v9 = vrot.slane %v1109_v0, 1  ;;  %v1127_v10 = vrot.slane %v1126_v3, 4  ;;  %v1091_v11 = vmax.f32 %v2355_v36, %v2385_v35 }
 0x185   : > { %1696 = vpow2.f32 %v1158_v63  ;;  %v1164_v16 = vmul.f32 1.442695, %v1144_v1  ;;  %v1166_v18 = vmul.f32 1.442695, %v1145_v4 }
 0x186   : > { %v1111_v26 = vmax.f32 %v1109_v0, %v1110_v9  ;;  %v1128_v27 = vmax.f32 %v1126_v3, %v1127_v10  ;;  %v1092_v29 = vrot.slane %v1091_v11, 4 }
 0x187   : > { %1698 = vpow2.f32 %v1164_v16 }
 0x188   : > { %1700 = vpow2.f32 %v1166_v18  ;;  %v1146_v31 = vsub.f32 %v2369_v49, %v1111_v26  ;;  %v1147_v32 = vsub.f32 %v2363_v43, %v1111_v26  ;;  %v1129_v33 = vrot.slane %v1128_v27, 2 }
 0x189   : > { %v1093_v40 = vmax.f32 %v1091_v11, %v1092_v29  ;;  %v2391_v28 = vpop.xlane.xlu0 %683 }
 0x18a   : > { %v2393_v44 = vpop.eup %1694  ;;  %v1168_v45 = vmul.f32 1.442695, %v1146_v31  ;;  %v1170_v46 = vmul.f32 1.442695, %v1147_v32  ;;  %v1130_v47 = vmax.f32 %v1128_v27, %v1129_v33  ;;  %v1112_v48 = vmax.f32 %v2379_v2, %v2391_v28 }
 0x18b   : > { %v2397_v50 = vpop.eup %1696  ;;  %v1094_v51 = vrot.slane %v1093_v40, 2  ;;  %v2399_v52 = vpop.xlane.xlu1 %686 }
 0x18c   : > { %v1188_v53 = vadd.f32 %v2397_v50, %v2393_v44  ;;  %1702 = vpow2.f32 %v1168_v45  ;;  %v1131_v54 = vrot.slane %v1130_v47, 1  ;;  %v1113_v56 = vrot.slane %v1112_v48, 4 }
 0x18d   : > { %v2405_v41 = vpop.eup %1698  ;;  %1704 = vpow2.f32 %v1170_v46  ;;  %v1095_v57 = vmax.f32 %v1093_v40, %v1094_v51  ;;  %v1119_v30 = vmax.f32 %v2399_v52, %v2403_v55 }
 0x18e   : > { %v2409_v58 = vpop.eup %1700  ;;  %v1189_v59 = vrot.slane %v1188_v53, 4  ;;  %v1132_v60 = vmax.f32 %v1130_v47, %v1131_v54  ;;  %v1114_v62 = vmax.f32 %v1112_v48, %v1113_v56 }
 0x18f   : > { %v1202_v63 = vadd.f32 %v2409_v58, %v2405_v41  ;;  %v1096_v0 = vrot.slane %v1095_v57, 1  ;;  %v1120_v3 = vrot.slane %v1119_v30, 4 }
 0x190   : > { %v1190_v1 = vadd.f32 %v1189_v59, %v1188_v53  ;;  %v1152_v4 = vsub.f32 %v2377_v61, %v1132_v60  ;;  %v1153_v9 = vsub.f32 %v2373_v38, %v1132_v60  ;;  %v1115_v10 = vrot.slane %v1114_v62, 2 }
 0x191   : > { %v1203_v11 = vrot.slane %v1202_v63, 4  ;;  %v1097_v16 = vmax.f32 %v1095_v57, %v1096_v0  ;;  %v1121_v18 = vmax.f32 %v1119_v30, %v1120_v3 }
 0x192   : > { %v2415_v26 = vpop.eup %1702  ;;  %v1191_v27 = vrot.slane %v1190_v1, 2  ;;  %v1180_v29 = vmul.f32 1.442695, %v1152_v4  ;;  %v1182_v31 = vmul.f32 1.442695, %v1153_v9  ;;  %v1116_v32 = vmax.f32 %v1114_v62, %v1115_v10 }
 0x193   : > { %v2417_v33 = vpop.eup %1704  ;;  %v1204_v40 = vadd.f32 %v1203_v11, %v1202_v63  ;;  %v1142_v45 = vsub.f32 %v2355_v36, %v1097_v16  ;;  %v1143_v46 = vsub.f32 %v2385_v35, %v1097_v16  ;;  %v1122_v47 = vrot.slane %v1121_v18, 2  ;;  %v2424_v4 = vpop.xlane.xlu1 %701 }
 0x194   : > { %v1192_v48 = vadd.f32 %v1191_v27, %v1190_v1  ;;  %v1209_v51 = vadd.f32 %v2417_v33, %v2415_v26  ;;  %1706 = vpow2.f32 %v1180_v29  ;;  %v1117_v53 = vrot.slane %v1116_v32, 1 }
 0x195   : > { %v1205_v54 = vrot.slane %v1204_v40, 2  ;;  %1708 = vpow2.f32 %v1182_v31  ;;  %v1160_v56 = vmul.f32 1.442695, %v1142_v45  ;;  %v1162_v57 = vmul.f32 1.442695, %v1143_v46  ;;  %v2429_v31 = vpop.xlane.xlu0 %698 }
 0x196   : > { %v1193_v30 = vrot.slane %v1192_v48, 1  ;;  %v1210_v59 = vrot.slane %v1209_v51, 4  ;;  %v1118_v60 = vmax.f32 %v1116_v32, %v1117_v53  ;;  %v1123_v62 = vmax.f32 %v1121_v18, %v1122_v47 }
 0x197   : > { %v1206_v63 = vadd.f32 %v1205_v54, %v1204_v40  ;;  %1710 = vpow2.f32 %v1160_v56  ;;  %v1133_v45 = vmax.f32 %v2429_v31, %v2424_v4 }
 0x198   : > { %v1194_v0 = vadd.f32 %v1193_v30, %v1192_v48  ;;  %v1211_v3 = vadd.f32 %v1210_v59, %v1209_v51  ;;  %1712 = vpow2.f32 %v1162_v57  ;;  %v1148_v1 = vsub.f32 %v2379_v2, %v1118_v60 }
 0x199   : > { %v1207_v9 = vrot.slane %v1206_v63, 1  ;;  %v1149_v10 = vsub.f32 %v2391_v28, %v1118_v60  ;;  %v1124_v11 = vrot.slane %v1123_v62, 1  ;;  %v1134_v56 = vrot.slane %v1133_v45, 4 }
 0x19a   : > { %v2427_v16 = vpop.eup %1706  ;;  %v1212_v27 = vrot.slane %v1211_v3, 2  ;;  %v1172_v29 = vmul.f32 1.442695, %v1148_v1  ;;  %1714 = vrcp.f32 %v1194_v0 }
 0x19b   : > { %v2431_v18 = vpop.eup %1708  ;;  %v1174_v32 = vmul.f32 1.442695, %v1149_v10  ;;  %v1125_v40 = vmax.f32 %v1123_v62, %v1124_v11  ;;  %v1208_v46 = vadd.f32 %v1207_v9, %v1206_v63  ;;  %v1135_v0 = vmax.f32 %v1133_v45, %v1134_v56 }
 0x19c   : > { %v1213_v47 = vadd.f32 %v1212_v27, %v1211_v3  ;;  %v1230_v48 = vadd.f32 %v2431_v18, %v2427_v16  ;;  %1716 = vpow2.f32 %v1172_v29  ;;  %v742_v9 = vlaneseq }
 0x19d   : > { %v2437_v51 = vpop.eup %1710  ;;  %v1150_v53 = vsub.f32 %v2399_v52, %v1125_v40  ;;  %v1151_v54 = vsub.f32 %v2403_v55, %v1125_v40  ;;  %1718 = vpow2.f32 %v1174_v32  ;;  %v1136_v40 = vrot.slane %v1135_v0, 2 }
 0x19e   : > { %v2441_v57 = vpop.eup %1712  ;;  %v1214_v30 = vrot.slane %v1213_v47, 1  ;;  %v1231_v59 = vrot.slane %v1230_v48, 4  ;;  %1720 = vrcp.f32 %v1208_v46 }
 0x19f   : > { %v1195_v60 = vadd.f32 %v2441_v57, %v2437_v51  ;;  %v1176_v62 = vmul.f32 1.442695, %v1150_v53  ;;  %v1178_v63 = vmul.f32 1.442695, %v1151_v54  ;;  %v2449_v53 = vand.u32 127, %v742_v9 }
 0x1a0   : > { %v1215_v3 = vadd.f32 %v1214_v30, %v1213_v47  ;;  %v1232_v1 = vadd.f32 %v1231_v59, %v1230_v48  ;;  %v1715_v10 = vpop.eup %1714  ;;  %v1137_v45 = vmax.f32 %v1135_v0, %v1136_v40  ;;  %v2455_v59 = vpop.permute.xlu2 %707 }
 0x1a1   : > { %v1196_v11 = vrot.slane %v1195_v60, 4  ;;  %1722 = vpow2.f32 %v1176_v62  ;;  %v1252_v46 = vmul.f32 %v1715_v10, %v2393_v44  ;;  %v1253_v47 = vmul.f32 %v1715_v10, %v2397_v50 }
 0x1a2   : > { %v2445_v27 = vpop.eup %1716  ;;  %1724 = vrcp.f32 %v1215_v3  ;;  %v1233_v29 = vrot.slane %v1232_v1, 2  ;;  %v1138_v0 = vrot.slane %v1137_v45, 1 }
 0x1a3   : > { %v1197_v25 = vadd.f32 %v1196_v11, %v1195_v60  ;;  %1726 = vpow2.f32 %v1178_v63  ;;  %v2447_v32 = vpop.eup %1718  ;;  %v1268_v50 = vmul.f32 %v1252_v46, %v2218_v5  ;;  %v1269_v9 = vmul.f32 %v1253_v47, %v2238_v12 }
 0x1a4   : > { %v1234_v23 = vadd.f32 %v1233_v29, %v1232_v1  ;;  %v1216_v54 = vadd.f32 %v2447_v32, %v2445_v27  ;;  %v1721_v56 = vpop.eup %1720  ;;  %v2460_v1 = vadd.s32 4294967288, %v2449_v53  ;;  %v2468_v11 = vadd.f32 %v2455_v59, %v2399_v52 }
 0x1a5   : > { %v1198_v48 = vrot.slane %v1197_v25, 2  ;;  %v1256_v29 = vmul.f32 %v1721_v56, %v2405_v41  ;;  %v1257_v38 = vmul.f32 %v1721_v56, %v2409_v58  ;;  %v1139_v8 = vmax.f32 %v1137_v45, %v1138_v0 }
 0x1a6   : > { %v1235_v30 = vrot.slane %v1234_v23, 1  ;;  %v1217_v63 = vrot.slane %v1216_v54, 4  ;;  %v2478_v52 = vadd.f32 %v2455_v59, %v2353_v34  ;;  %v2483_v41 = vadd.f32 %v2455_v59, %v2429_v31 }
 0x1a7   : > { %v2457_v60 = vpop.eup %1722  ;;  %v1199_v62 = vadd.f32 %v1198_v48, %v1197_v25  ;;  %v2487_v58 = vadd.f32 %v2455_v59, %v2424_v4  ;;  %v1273_v34 = vmul.f32 %v1257_v38, %v2241_v13  ;;  %v1154_v0 = vsub.f32 %v2429_v31, %v1139_v8 }
 0x1a8   : > { %v1725_v3 = vpop.eup %1724  ;;  %v1236_v25 = vadd.f32 %v1235_v30, %v1234_v23  ;;  %v1218_v40 = vadd.f32 %v1217_v63, %v1216_v54  ;;  %v1284_v23 = vsel %vm433_vm0, %v1268_v50, 0.0  ;;  %v1285_v54 = vsel %vm433_vm0, %v1269_v9, 0.0 }
 0x1a9   : > { %v2462_v44 = vpop.eup %1726  ;;  %v1200_v10 = vrot.slane %v1199_v62, 1  ;;  %v1258_v61 = vmul.f32 %v1725_v3, %v2415_v26  ;;  %v1259_v5 = vmul.f32 %v1725_v3, %v2417_v33  ;;  %v1272_v26 = vmul.f32 %v1256_v29, %v2221_v6 }
 0x1aa   : > { %v1223_v48 = vadd.f32 %v2462_v44, %v2457_v60  ;;  %v1219_v12 = vrot.slane %v1218_v40, 2  ;;  %v761_v63 = vperm.slane %v2468_v11, %v2449_v53  ;;  %v767_v6 = vperm.slane %v2483_v41, %v2449_v53 }
 0x1ab   : > { %v1201_v46 = vadd.f32 %v1200_v10, %v1199_v62  ;;  %v1274_v56 = vmul.f32 %v1258_v61, %v2224_v7  ;;  %v1275_v30 = vmul.f32 %v1259_v5, %v2244_v14  ;;  %v768_v50 = vperm.slane %v2487_v58, %v2460_v1 }
 0x1ac   : > { %v1224_v47 = vrot.slane %v1223_v48, 4  ;;  %v1220_v33 = vadd.f32 %v1219_v12, %v1218_v40  ;;  %v2503_v13 = vadd.f32 %v2455_v59, %v2359_v39  ;;  %v2507_v7 = vadd.f32 %v2455_v59, %v2355_v36 }
 0x1ad   : > { %1728 = vrcp.f32 %v1201_v46  ;;  %v1286_v14 = vadd.f32 %v1285_v54, %v1284_v23  ;;  %v1302_v38 = vsel %vm433_vm0, %v1272_v26, 0.0  ;;  %v1303_v10 = vsel %vm433_vm0, %v1273_v34, 0.0 }
 0x1ae   : > { %1730 = vrcp.f32 %v1236_v25  ;;  %v1225_v45 = vadd.f32 %v1224_v47, %v1223_v48  ;;  %v1221_v62 = vrot.slane %v1220_v33, 1  ;;  %v1311_v29 = vsel %vm433_vm0, %v1274_v56, 0.0 }
 0x1af   : > { %v1312_v25 = vsel %vm433_vm0, %v1275_v30, 0.0  ;;  %v1155_v40 = vsub.f32 %v2424_v4, %v1139_v8  ;;  %v1184_v5 = vmul.f32 1.442695, %v1154_v0  ;;  %v2518_v12 = vadd.f32 %v2455_v59, %v2385_v35 }
 0x1b0   : > { %v1226_v3 = vrot.slane %v1225_v45, 2  ;;  %v1222_v61 = vadd.f32 %v1221_v62, %v1220_v33  ;;  %v2522_v47 = vadd.f32 %v2455_v59, %v2357_v37  ;;  %v2526_v23 = vadd.f32 %v2455_v59, %v2365_v42 }
 0x1b1   : > { %v1287_v8 = vrot.slane %v1286_v14, 4  ;;  %v2528_v4 = vadd.f32 %v1303_v10, %v1302_v38  ;;  %v2532_v26 = vadd.f32 %v1312_v25, %v1311_v29  ;;  %v2551_v30 = vadd.f32 %v2455_v59, %v2379_v2 }
 0x1b2   : > { %v1227_v9 = vadd.f32 %v1226_v3, %v1225_v45  ;;  %1732 = vrcp.f32 %v1222_v61  ;;  %v1186_v45 = vmul.f32 1.442695, %v1155_v40  ;;  %v2564_v61 = vadd.f32 %v2455_v59, %v2403_v55 }
 0x1b3   : > { %v1729_v31 = vpop.eup %1728  ;;  %1734 = vpow2.f32 %v1184_v5  ;;  %v2546_v56 = vadd.f32 %v1287_v8, %v1286_v14  ;;  %v1314_v62 = vrot.slane %v2532_v26, 4  ;;  %v2560_v14 = vadd.f32 %v2455_v59, %v2391_v28 }
 0x1b4   : > { %v1731_v39 = vpop.eup %1730  ;;  %v1254_v48 = vmul.f32 %v1729_v31, %v2437_v51  ;;  %v1255_v36 = vmul.f32 %v1729_v31, %v2441_v57  ;;  %v1228_v46 = vrot.slane %v1227_v9, 1  ;;  %v750_v28 = vperm.slane %v2518_v12, %v2460_v1 }
 0x1b5   : > { %v1264_v35 = vmul.f32 %v1731_v39, %v2427_v16  ;;  %v1265_v37 = vmul.f32 %v1731_v39, %v2431_v18  ;;  %v1305_v18 = vrot.slane %v2528_v4, 4  ;;  %v753_v29 = vperm.slane %v2526_v23, %v2460_v1 }
 0x1b6   : > { %v1270_v51 = vmul.f32 %v1254_v48, %v2258_v17  ;;  %v1271_v57 = vmul.f32 %v1255_v36, %v2276_v21  ;;  %v1229_v33 = vadd.f32 %v1228_v46, %v1227_v9  ;;  %v2540_v17 = vadd.f32 %v2455_v59, %v2369_v49 }
 0x1b7   : > { %v2544_v21 = vadd.f32 %v2455_v59, %v2363_v43  ;;  %v1280_v43 = vmul.f32 %v1264_v35, %v2247_v15  ;;  %v1281_v38 = vmul.f32 %v1265_v37, %v2266_v20  ;;  %v746_v15 = vperm.slane %v2503_v13, %v2460_v1  ;;  %v2920_v35 = vld [vmem:[#allocation24_spill] sm:$0xff] }
 0x1b8   : > { %v1293_v54 = vsel %vm433_vm0, %v1270_v51, 0.0  ;;  %v1294_v42 = vsel %vm433_vm0, %v1271_v57, 0.0  ;;  %1736 = vrcp.f32 %v1229_v33  ;;  %v1733_v16 = vpop.eup %1732  ;;  %v749_v20 = vperm.slane %v2507_v7, %v2449_v53  ;;  %v2921_v37 = vld [vmem:[#allocation28_spill] sm:$0xff] }
 0x1b9   : > { %v1295_v34 = vadd.f32 %v1294_v42, %v1293_v54  ;;  %1738 = vpow2.f32 %v1186_v45  ;;  %v1260_v49 = vmul.f32 %v1733_v16, %v2445_v27  ;;  %v1261_v0 = vmul.f32 %v1733_v16, %v2447_v32  ;;  %v2572_v32 = vpop.eup %1734  ;;  %v2922_v42 = vld [vmem:[#allocation27_spill] sm:$0xff] }
 0x1ba   : > { %v744_v27 = vperm.slane %v2478_v52, %v2449_v53  ;;  %v755_v48 = vperm.slane %v2540_v17, %v2449_v53  ;;  %v756_v36 = vperm.slane %v2544_v21, %v2460_v1  ;;  %v758_v8 = vperm.slane %v2551_v30, %v2449_v53 }
 0x1bb   : > { %v1296_v3 = vrot.slane %v1295_v34, 4  ;;  %v1276_v2 = vmul.f32 %v1260_v49, %v2263_v19  ;;  %v1277_v9 = vmul.f32 %v1261_v0, %v2279_v22  ;;  %v752_v19 = vperm.slane %v2522_v47, %v2449_v53 }
 0x1bc   : > { %v759_v51 = vperm.slane %v2560_v14, %v2460_v1  ;;  %v2606_v54 = vadd.f32 %v2455_v59, %v2921_v37  ;;  %v748_v16 = vsel %vm747_vm1, %v746_v15, %v744_v27  ;;  %v751_v49 = vsel %vm747_vm1, %v750_v28, %v749_v20 }
 0x1bd   : > { %v2580_v22 = vadd.f32 %v1296_v3, %v1295_v34  ;;  %v1320_v31 = vsel %vm433_vm0, %v1276_v2, 0.0  ;;  %v1321_v10 = vsel %vm433_vm0, %v1277_v9, 0.0  ;;  %v2610_v34 = vadd.f32 %v2455_v59, %v2922_v42 }
 0x1be   : > { %v1737_v55 = vpop.eup %1736  ;;  %v1322_v5 = vadd.f32 %v1321_v10, %v1320_v31  ;;  %v754_v0 = vsel %vm747_vm1, %v753_v29, %v752_v19  ;;  %v757_v2 = vsel %vm747_vm1, %v756_v36, %v755_v48  ;;  %v760_v9 = vsel %vm747_vm1, %v759_v51, %v758_v8 }
 0x1bf   : > { %v2586_v25 = vpop.eup %1738  ;;  %v1262_v40 = vmul.f32 %v1737_v55, %v2457_v60  ;;  %v1263_v39 = vmul.f32 %v1737_v55, %v2462_v44  ;;  %v1338_v60 = vsel %vm433_vm0, %v1280_v43, 0.0  ;;  %v1339_v44 = vsel %vm433_vm0, %v1281_v38, 0.0 }
 0x1c0   : > { %v1237_v46 = vadd.f32 %v2586_v25, %v2572_v32  ;;  %v1298_v3 = vrot.slane %v2580_v22, 2  ;;  %v1323_v43 = vrot.slane %v1322_v5, 4  ;;  %v764_v15 = vperm.slane %v2606_v54, %v2449_v53 }
 0x1c1   : > { %v1278_v57 = vmul.f32 %v1262_v40, %v2291_v24  ;;  %v1279_v33 = vmul.f32 %v1263_v39, %v2920_v35  ;;  %v762_v24 = vperm.slane %v2564_v61, %v2460_v1  ;;  %v765_v20 = vperm.slane %v2610_v34, %v2460_v1 }
 0x1c2   : > { %v1238_v45 = vrot.slane %v1237_v46, 4  ;;  %v771_v28 = vsel %vm770_vm2, %v751_v49, %v748_v16  ;;  %v769_v39 = vsel %vm747_vm1, %v768_v50, %v767_v6  ;;  %v1306_v8 = vadd.f32 %v1305_v18, %v2528_v4 }
 0x1c3   : > { %v1329_v59 = vsel %vm433_vm0, %v1278_v57, 0.0  ;;  %v1330_v55 = vsel %vm433_vm0, %v1279_v33, 0.0  ;;  %v763_v19 = vsel %vm747_vm1, %v762_v24, %v761_v63  ;;  %v773_v31 = vsel %vm772_vm3, %v754_v0, %v771_v28 }
 0x1c4   : > { %v1239_v38 = vadd.f32 %v1238_v45, %v1237_v46  ;;  %v1331_v10 = vadd.f32 %v1330_v55, %v1329_v59  ;;  %v775_v40 = vsel %vm774_vm4, %v757_v2, %v773_v31  ;;  %v766_v36 = vsel %vm747_vm1, %v765_v20, %v764_v15  ;;  %v2924_v15 = vld [vmem:[#allocation26_spill] sm:$0xff] }
 0x1c5   : > { %v777_v48 = vsel %vm776_vm5, %v760_v9, %v775_v40  ;;  %v1289_v57 = vrot.slane %v2546_v56, 2  ;;  %v1340_v33 = vadd.f32 %v1339_v44, %v1338_v60  ;;  %v1324_v45 = vadd.f32 %v1323_v43, %v1322_v5 }
 0x1c6   : > { %v1240_v27 = vrot.slane %v1239_v38, 2  ;;  %v779_v46 = vsel %vm778_vm6, %v763_v19, %v777_v48  ;;  %v1332_v35 = vrot.slane %v1331_v10, 4  ;;  %v1315_v42 = vadd.f32 %v1314_v62, %v2532_v26 }
 0x1c7   : > { %v781_v51 = vsel %vm780_vm7, %v766_v36, %v779_v46  ;;  %v1299_v16 = vadd.f32 %v1298_v3, %v2580_v22  ;;  %v1307_v4 = vrot.slane %v1306_v8, 2  ;;  %v1290_v18 = vadd.f32 %v1289_v57, %v2546_v56 }
 0x1c8   : > { %v1241_v29 = vadd.f32 %v1240_v27, %v1239_v38  ;;  %v783_v50 = vsel %vm782_vm8, %v769_v39, %v781_v51  ;;  %v1333_v49 = vadd.f32 %v1332_v35, %v1331_v10  ;;  %v1341_v0 = vrot.slane %v1340_v33, 4  ;;  %v2923_v27 = vld [vmem:[#allocation25_spill] sm:$0xff] }
 0x1c9   : > { %v786_v37 = vsel %vm785_vm9, %v783_v50, -inf  ;;  %v1325_v24 = vrot.slane %v1324_v45, 2  ;;  %v1316_v38 = vrot.slane %v1315_v42, 2  ;;  %v1300_v2 = vrot.slane %v1299_v16, 1 }
 0x1ca   : > { %v1242_v63 = vrot.slane %v1241_v29, 1  ;;  %787 = vmax.xlane.f32.xlu0 %v786_v37  ;;  %v1308_v60 = vadd.f32 %v1307_v4, %v1306_v8  ;;  %v1291_v44 = vrot.slane %v1290_v18, 1  ;;  %v1334_v43 = vrot.slane %v1333_v49, 2 }
 0x1cb   : > { %v1342_v9 = vadd.f32 %v1341_v0, %v1340_v33  ;;  %v1326_v59 = vadd.f32 %v1325_v24, %v1324_v45  ;;  %v1317_v22 = vadd.f32 %v1316_v38, %v1315_v42  ;;  %v1301_v3 = vadd.f32 %v1300_v2, %v1299_v16 }
 0x1cc   : > { %v1243_v6 = vadd.f32 %v1242_v63, %v1241_v29  ;;  %v1309_v55 = vrot.slane %v1308_v60, 1  ;;  %v1292_v28 = vadd.f32 %v1291_v44, %v1290_v18  ;;  %v1335_v19 = vadd.f32 %v1334_v43, %v1333_v49 }
 0x1cd   : > { %v1327_v31 = vrot.slane %v1326_v59, 1  ;;  %v1343_v40 = vrot.slane %v1342_v9, 2  ;;  %v1318_v39 = vrot.slane %v1317_v22, 1 }
 0x1ce   : > { %1740 = vrcp.f32 %v1243_v6  ;;  %v1336_v36 = vrot.slane %v1335_v19, 1 }
 0x1cf   : > { %v1328_v46 = vadd.f32 %v1327_v31, %v1326_v59  ;;  %v1344_v8 = vadd.f32 %v1343_v40, %v1342_v9  ;;  %v1319_v57 = vadd.f32 %v1318_v39, %v1317_v22 }
 0x1d0   : > { %v1337_v6 = vadd.f32 %v1336_v36, %v1335_v19 }
 0x1d1   : > { %v1345_v45 = vrot.slane %v1344_v8, 1 }
 0x1d3   : > { %v1346_v18 = vadd.f32 %v1345_v45, %v1344_v8 }
 0x1d4   : > { %v1741_v5 = vpop.eup %1740 }
 0x1d5   : > { %v1266_v26 = vmul.f32 %v1741_v5, %v2572_v32  ;;  %v1267_v62 = vmul.f32 %v1741_v5, %v2586_v25  ;;  %v1364_v32 = vsel %vm770_vm2, %v1301_v3, %v1292_v28  ;;  %v1310_v25 = vadd.f32 %v1309_v55, %v1308_v60 }
 0x1d7   : > { %v1282_v56 = vmul.f32 %v1266_v26, %v2923_v27  ;;  %v1283_v20 = vmul.f32 %v1267_v62, %v2924_v15  ;;  %v1365_v51 = vsel %vm772_vm3, %v1310_v25, %v1364_v32 }
 0x1d8   : > { %v1366_v50 = vsel %vm774_vm4, %v1319_v57, %v1365_v51 }
 0x1d9   : > { %v1347_v10 = vsel %vm433_vm0, %v1282_v56, 0.0  ;;  %v1348_v29 = vsel %vm433_vm0, %v1283_v20, 0.0  ;;  %v1367_v37 = vsel %vm776_vm5, %v1328_v46, %v1366_v50 }
 0x1da   : > { %v1349_v48 = vadd.f32 %v1348_v29, %v1347_v10  ;;  %v1368_v16 = vsel %vm778_vm6, %v1337_v6, %v1367_v37 }
 0x1db   : > { %v1369_v0 = vsel %vm780_vm7, %v1346_v18, %v1368_v16 }
 0x1dc   : > { %v1350_v63 = vrot.slane %v1349_v48, 4 }
 0x1de   : > { %v1351_v35 = vadd.f32 %v1350_v63, %v1349_v48 }
 0x1e0   : > { %v1352_v33 = vrot.slane %v1351_v35, 2 }
 0x1e2   : > { %v1353_v42 = vadd.f32 %v1352_v33, %v1351_v35 }
 0x1e4   : > { %v1354_v4 = vrot.slane %v1353_v42, 1 }
 0x1e6   : > { %v1355_v49 = vadd.f32 %v1354_v4, %v1353_v42 }
 0x1e8   : > { %v1370_v24 = vsel %vm782_vm8, %v1355_v49, %v1369_v0 }
 0x1e9   : > { %1372 = vst.msk [vmem:[%s404_s15] sm:$0xff] %vm433_vm0, %v1370_v24 }
 0x23d   : > { %v2672_v38 = vpop.xlane.xlu0 %787 }
 0x23e   : > { %v791_v2 = vperm.slane %v2672_v38, 1  ;;  %v790_v60 = vperm.slane %v2672_v38, 0  ;;  %v795_v9 = vperm.slane %v2672_v38, 5  ;;  %v792_v59 = vperm.slane %v2672_v38, 2 }
 0x23f   : > { %v793_v20 = vperm.slane %v2672_v38, 3  ;;  %v794_v39 = vperm.slane %v2672_v38, 4  ;;  %v797_v35 = vperm.slane %v2672_v38, 7 }
 0x240   : > { %v808_v5 = vsub.f32 %v2507_v7, %v791_v2  ;;  %v807_v44 = vsub.f32 %v2503_v13, %v790_v60  ;;  %v806_v43 = vsub.f32 %v2478_v52, %v790_v60  ;;  %v809_v3 = vsub.f32 %v2518_v12, %v791_v2 }
 0x241   : > { %v816_v55 = vsub.f32 %v2468_v11, %v795_v9  ;;  %v811_v7 = vsub.f32 %v2526_v23, %v792_v59  ;;  %v796_v52 = vperm.slane %v2672_v38, 6  ;;  %v810_v11 = vsub.f32 %v2522_v47, %v792_v59 }
 0x242   : > { %v826_v26 = vmul.f32 1.442695, %v808_v5  ;;  %v824_v62 = vmul.f32 1.442695, %v807_v44  ;;  %v822_v22 = vmul.f32 1.442695, %v806_v43  ;;  %v813_v19 = vsub.f32 %v2544_v21, %v793_v20 }
 0x243   : > { %v828_v27 = vmul.f32 1.442695, %v809_v3  ;;  %v842_v13 = vmul.f32 1.442695, %v816_v55  ;;  %v832_v15 = vmul.f32 1.442695, %v811_v7  ;;  %v819_v23 = vsub.f32 %v2610_v34, %v796_v52 }
 0x244   : > { %1742 = vpow2.f32 %v826_v26  ;;  %v830_v31 = vmul.f32 1.442695, %v810_v11  ;;  %v836_v40 = vmul.f32 1.442695, %v813_v19  ;;  %v812_v34 = vsub.f32 %v2540_v17, %v793_v20 }
 0x245   : > { %1744 = vpow2.f32 %v824_v62  ;;  %v848_v10 = vmul.f32 1.442695, %v819_v23  ;;  %v815_v21 = vsub.f32 %v2560_v14, %v794_v39  ;;  %v814_v17 = vsub.f32 %v2551_v30, %v794_v39 }
 0x246   : > { %1746 = vpow2.f32 %v822_v22  ;;  %v834_v32 = vmul.f32 1.442695, %v812_v34  ;;  %v818_v14 = vsub.f32 %v2606_v54, %v796_v52  ;;  %v817_v50 = vsub.f32 %v2564_v61, %v795_v9 }
 0x247   : > { %1748 = vpow2.f32 %v828_v27  ;;  %v840_v63 = vmul.f32 1.442695, %v815_v21  ;;  %v838_v8 = vmul.f32 1.442695, %v814_v17  ;;  %v821_v30 = vsub.f32 %v2487_v58, %v797_v35 }
 0x248   : > { %1750 = vpow2.f32 %v842_v13  ;;  %v846_v57 = vmul.f32 1.442695, %v818_v14  ;;  %v844_v33 = vmul.f32 1.442695, %v817_v50  ;;  %v820_v42 = vsub.f32 %v2483_v41, %v797_v35 }
 0x249   : > { %1752 = vpow2.f32 %v832_v15  ;;  %v852_v45 = vmul.f32 1.442695, %v821_v30 }
 0x24a   : > { %v2685_v56 = vpop.eup %1742  ;;  %1754 = vpow2.f32 %v830_v31  ;;  %v850_v61 = vmul.f32 1.442695, %v820_v42 }
 0x24b   : > { %v2688_v28 = vpop.eup %1744  ;;  %877 = vperm.xlu2 %1688, %v2685_v56   ;;  %1756 = vpow2.f32 %v848_v10 }
 0x24c   : > { %v2691_v12 = vpop.eup %1746  ;;  %874 = vperm.xlu0 %1690, %v2688_v28   ;;  %1758 = vpow2.f32 %v836_v40 }
 0x24d   : > { %871 = vperm.xlu1 %1689, %v2691_v12   ;;  %v2698_v29 = vpop.eup %1748  ;;  %1760 = vpow2.f32 %v834_v32 }
 0x24e   : > { %v2701_v48 = vpop.eup %1750  ;;  %1762 = vpow2.f32 %v840_v63 }
 0x24f   : > { %v2704_v47 = vpop.eup %1752  ;;  %1764 = vpow2.f32 %v838_v8 }
 0x250   : > { %v2710_v25 = vpop.eup %1754  ;;  %1766 = vpow2.f32 %v846_v57 }
 0x251   : > { %v2712_v36 = vpop.eup %1756  ;;  %1768 = vpow2.f32 %v844_v33 }
 0x252   : > { %v2715_v46 = vpop.eup %1758  ;;  %1770 = vpow2.f32 %v852_v45 }
 0x253   : > { %880 = vperm.xlu2 %1688, %v2698_v29   ;;  %v2721_v51 = vpop.eup %1760  ;;  %1772 = vpow2.f32 %v850_v61 }
 0x254   : > { %901 = vperm.xlu0 %1690, %v2701_v48   ;;  %v2725_v6 = vpop.eup %1762 }
 0x255   : > { %886 = vperm.xlu1 %1689, %v2704_v47   ;;  %v2730_v54 = vpop.eup %1764 }
 0x256   : > { %v2733_v37 = vpop.eup %1766 }
 0x257   : > { %v2737_v16 = vpop.eup %1768 }
 0x258   : > { %v2740_v58 = vpop.eup %1770 }
 0x259   : > { %v2743_v4 = vpop.eup %1772 }
 0x25b   : > { %883 = vperm.xlu2 %1688, %v2710_v25  }
 0x25c   : > { %910 = vperm.xlu0 %1690, %v2712_v36  }
 0x25d   : > { %892 = vperm.xlu1 %1689, %v2715_v46  }
 0x263   : > { %889 = vperm.xlu2 %1688, %v2721_v51  }
 0x265   : > { %898 = vperm.xlu1 %1689, %v2725_v6  }
 0x26b   : > { %895 = vperm.xlu2 %1688, %v2730_v54  }
 0x26d   : > { %907 = vperm.xlu1 %1689, %v2733_v37  }
 0x273   : > { %904 = vperm.xlu2 %1688, %v2737_v16  }
 0x275   : > { %916 = vperm.xlu1 %1689, %v2740_v58  }
 0x27b   : > { %913 = vperm.xlu2 %1688, %v2743_v4  }
 0x2a5   : > { %v878_v18 = vpop.permute.xlu2 %877 }
 0x2a6   : > { %v921_v13 = vperm.slane %v878_v18, %v2449_v53 }
 0x2ad   : > { %v881_v49 = vpop.permute.xlu2 %880 }
 0x2ae   : > { %v922_v22 = vperm.slane %v881_v49, %v2460_v1 }
 0x2b0   : > { %v923_v23 = vsel %vm747_vm1, %v922_v22, %v921_v13 }
 0x2b5   : > { %v884_v41 = vpop.permute.xlu2 %883 }
 0x2b6   : > { %v924_v55 = vperm.slane %v884_v41, %v2449_v53 }
 0x2bd   : > { %v890_v24 = vpop.permute.xlu2 %889 }
 0x2be   : > { %v875_v2 = vpop.permute.xlu0 %874  ;;  %v927_v52 = vperm.slane %v890_v24, %v2449_v53 }
 0x2bf   : > { %v872_v0 = vpop.permute.xlu1 %871  ;;  %v919_v59 = vperm.slane %v875_v2, %v2460_v1 }
 0x2c0   : > { %v918_v26 = vperm.slane %v872_v0, %v2449_v53 }
 0x2c2   : > { %v920_v15 = vsel %vm747_vm1, %v919_v59, %v918_v26 }
 0x2c3   : > { %v942_v10 = vsel %vm770_vm2, %v923_v23, %v920_v15 }
 0x2c5   : > { %v896_v5 = vpop.permute.xlu2 %895 }
 0x2c6   : > { %v902_v43 = vpop.permute.xlu0 %901  ;;  %v930_v20 = vperm.slane %v896_v5, %v2449_v53 }
 0x2c7   : > { %v887_v38 = vpop.permute.xlu1 %886  ;;  %v933_v14 = vperm.slane %v902_v43, %v2449_v53 }
 0x2c8   : > { %v925_v62 = vperm.slane %v887_v38, %v2460_v1 }
 0x2ca   : > { %v926_v11 = vsel %vm747_vm1, %v925_v62, %v924_v55 }
 0x2cb   : > { %v943_v34 = vsel %vm772_vm3, %v926_v11, %v942_v10 }
 0x2cd   : > { %v905_v9 = vpop.permute.xlu2 %904 }
 0x2ce   : > { %v911_v19 = vpop.permute.xlu0 %910  ;;  %v934_v21 = vperm.slane %v905_v9, %v2460_v1 }
 0x2cf   : > { %v893_v60 = vpop.permute.xlu1 %892  ;;  %v937_v32 = vperm.slane %v911_v19, %v2460_v1 }
 0x2d0   : > { %v928_v3 = vperm.slane %v893_v60, %v2460_v1  ;;  %v935_v50 = vsel %vm747_vm1, %v934_v21, %v933_v14 }
 0x2d2   : > { %v929_v31 = vsel %vm747_vm1, %v928_v3, %v927_v52 }
 0x2d3   : > { %v944_v63 = vsel %vm774_vm4, %v929_v31, %v943_v34 }
 0x2d5   : > { %v914_v17 = vpop.permute.xlu2 %913 }
 0x2d6   : > { %v939_v30 = vperm.slane %v914_v17, %v2449_v53 }
 0x2d7   : > { %v899_v44 = vpop.permute.xlu1 %898 }
 0x2d8   : > { %v931_v7 = vperm.slane %v899_v44, %v2460_v1 }
 0x2da   : > { %v932_v40 = vsel %vm747_vm1, %v931_v7, %v930_v20 }
 0x2db   : > { %v945_v8 = vsel %vm776_vm5, %v932_v40, %v944_v63 }
 0x2dc   : > { %v946_v45 = vsel %vm778_vm6, %v935_v50, %v945_v8 }
 0x2df   : > { %v908_v27 = vpop.permute.xlu1 %907 }
 0x2e0   : > { %v936_v39 = vperm.slane %v908_v27, %v2449_v53 }
 0x2e2   : > { %v938_v57 = vsel %vm747_vm1, %v937_v32, %v936_v39 }
 0x2e3   : > { %v947_v61 = vsel %vm780_vm7, %v938_v57, %v946_v45 }
 0x2e7   : > { %v917_v35 = vpop.permute.xlu1 %916 }
 0x2e8   : > { %v940_v33 = vperm.slane %v917_v35, %v2460_v1 }
 0x2ea   : > { %v941_v42 = vsel %vm747_vm1, %v940_v33, %v939_v30 }
 0x2eb   : > { %v948_v18 = vsel %vm782_vm8, %v941_v42, %v947_v61 }
 0x2ec   : > { %v950_v49 = vsel %vm785_vm9, %v948_v18, 0.0 }
 0x2ed   : > { %951 = vadd.xlane.f32.xlu0 %v950_v49 }
 0x360   : > { %v952_v41 = vpop.xlane.xlu0 %951 }
 0x361   : > { %1774 = vrcp.f32 %v952_v41 }
 0x367   : > { %v1775_v0 = vpop.eup %1774 }
 0x368   : > { %v961_v24 = vperm.slane %v1775_v0, 6  ;;  %v955_v38 = vperm.slane %v1775_v0, 0  ;;  %v956_v44 = vperm.slane %v1775_v0, 1  ;;  %v957_v59 = vperm.slane %v1775_v0, 2 }
 0x36a   : > { %v983_v2 = vmul.f32 %v2733_v37, %v961_v24  ;;  %v972_v60 = vmul.f32 %v2688_v28, %v955_v38  ;;  %v971_v5 = vmul.f32 %v2691_v12, %v955_v38  ;;  %v974_v43 = vmul.f32 %v2698_v29, %v956_v44 }
 0x36b   : > { %v973_v9 = vmul.f32 %v2685_v56, %v956_v44  ;;  %v976_v26 = vmul.f32 %v2704_v47, %v957_v59  ;;  %v975_v37 = vmul.f32 %v2710_v25, %v957_v59  ;;  %v958_v28 = vperm.slane %v1775_v0, 3 }
 0x36c   : > { %1040 = vperm.xlu0 %1690, %v983_v2   ;;  %1007 = vperm.xlu1 %1689, %v972_v60   ;;  %v959_v56 = vperm.slane %v1775_v0, 4  ;;  %v960_v25 = vperm.slane %v1775_v0, 5 }
 0x36d   : > { %1004 = vperm.xlu2 %1688, %v971_v5   ;;  %v978_v12 = vmul.f32 %v2715_v46, %v958_v28  ;;  %v977_v62 = vmul.f32 %v2721_v51, %v958_v28  ;;  %v962_v46 = vperm.slane %v1775_v0, 7 }
 0x36e   : > { %v980_v29 = vmul.f32 %v2725_v6, %v959_v56  ;;  %v979_v47 = vmul.f32 %v2730_v54, %v959_v56  ;;  %v982_v22 = vmul.f32 %v2737_v16, %v960_v25  ;;  %v981_v3 = vmul.f32 %v2701_v48, %v960_v25 }
 0x374   : > { %1013 = vperm.xlu1 %1689, %v974_v43  }
 0x375   : > { %1010 = vperm.xlu2 %1688, %v973_v9  }
 0x37c   : > { %1019 = vperm.xlu1 %1689, %v976_v26  }
 0x37d   : > { %1016 = vperm.xlu2 %1688, %v975_v37  }
 0x384   : > { %1025 = vperm.xlu1 %1689, %v978_v12  }
 0x385   : > { %1022 = vperm.xlu2 %1688, %v977_v62  }
 0x38c   : > { %1031 = vperm.xlu1 %1689, %v980_v29  }
 0x38d   : > { %1028 = vperm.xlu2 %1688, %v979_v47  }
 0x394   : > { %1037 = vperm.xlu1 %1689, %v982_v22  }
 0x395   : > { %1034 = vperm.xlu2 %1688, %v981_v3  }
 0x396   : > { %1923 = shalt.err (!%p1920_p9)
}
 0x397   : > { %1620 = dma.vmem_to_hbm [thread:$0]  (%p2133_p3), %s1392_s11, 128, %s1394_s27, %s1374_s9   ;;  %v985_v48 = vmul.f32 %v2743_v4, %v962_v46  ;;  %v984_v51 = vmul.f32 %v2712_v36, %v961_v24  ;;  %v986_v6 = vmul.f32 %v2740_v58, %v962_v46 }
 0x398   : > { %s1403_s3 = scalar_lea.hbm %s2888_s8, %s1590_s20  ;;  %s411_s15 = scalar_lea.vmem [#allocation12], %s2202_s28 }
 0x399   : > { %s1405_s22 = sshll.u32 %s411_s15, 4  ;;  %s1407_s6 = sshll.u32 %s1403_s3, 4  ;;  %s1406_s22 = int_to_ptr.vmem [resolvable:$true] %s1405_s22  ;;  %s1408_s6 = int_to_ptr.hbm [resolvable:$true] %s1407_s6 }
 0x39a   : > { %s1379_s28 = scalar_lea.sflag [#allocation13], %s2190_s13  ;;  %s1938_s20 = sshra.s32 %s1408_s6, 4  ;;  %s1939_s20 = int_to_ptr.hbm [resolvable:$true] %s1938_s20 }
 0x39b   : > { %s1940_s2 = scalar_lea.hbm %s1939_s20, 8  ;;  %s1944_s27 = scalar_lea.hbm %s2888_s8, 16 }
 0x39c   : > { %1046 = vperm.xlu1 %1689, %v985_v48   ;;  %p1941_p12 = scmp.ne.s32.totalorder %s1939_s20, %s1940_s2  ;;  %p1945_p5 = scmp.lt.s32.totalorder %s1939_s20, %s2888_s8 }
 0x39d   : > { %1043 = vperm.xlu2 %1688, %v984_v51   ;;  %p1946_p7 = scmp.lt.s32.totalorder %s1944_s27, %s1940_s2 }
 0x39e   : > { %p1942_p13 = pnand %p1941_p12, %p2133_p3 }
 0x39f   : > { %p1947_p1 = por %p1946_p7, %p1945_p5 }
 0x3a0   : > { %p1943_p0 = pneg %p1942_p13 }
 0x3a2   : > { %p1948_p4 = pnand %p1947_p1, %p1943_p0 }
 0x3a5   : > { %1049 = vperm.xlu2 %1688, %v986_v6  }
 0x3c7   : > { %v1005_v54 = vpop.permute.xlu2 %1004 }
 0x3c8   : > { %v1051_v21 = vperm.slane %v1005_v54, %v2449_v53 }
 0x3cf   : > { %v1011_v16 = vpop.permute.xlu2 %1010 }
 0x3d0   : > { %v1054_v31 = vperm.slane %v1011_v16, %v2449_v53 }
 0x3d7   : > { %v1017_v55 = vpop.permute.xlu2 %1016 }
 0x3d8   : > { %v1057_v40 = vperm.slane %v1017_v55, %v2449_v53 }
 0x3de   : > { %v1008_v7 = vpop.permute.xlu1 %1007  ;;  %v1041_v45 = vpop.permute.xlu0 %1040 }
 0x3df   : > { %v1023_v27 = vpop.permute.xlu2 %1022  ;;  %v1052_v58 = vperm.slane %v1008_v7, %v2460_v1  ;;  %v1069_v24 = vperm.slane %v1041_v45, %v2449_v53 }
 0x3e0   : > { %v1060_v32 = vperm.slane %v1023_v27, %v2449_v53 }
 0x3e1   : > { %v1053_v57 = vsel %vm747_vm1, %v1052_v58, %v1051_v21 }
 0x3e6   : > { %v1014_v13 = vpop.permute.xlu1 %1013 }
 0x3e7   : > { %v1029_v52 = vpop.permute.xlu2 %1028  ;;  %v1055_v4 = vperm.slane %v1014_v13, %v2460_v1 }
 0x3e8   : > { %v1063_v14 = vperm.slane %v1029_v52, %v2449_v53 }
 0x3e9   : > { %v1056_v63 = vsel %vm747_vm1, %v1055_v4, %v1054_v31 }
 0x3ea   : > { %v1075_v30 = vsel %vm770_vm2, %v1056_v63, %v1053_v57 }
 0x3ee   : > { %v1020_v15 = vpop.permute.xlu1 %1019 }
 0x3ef   : > { %v1035_v11 = vpop.permute.xlu2 %1034  ;;  %v1058_v36 = vperm.slane %v1020_v15, %v2460_v1 }
 0x3f0   : > { %v1066_v35 = vperm.slane %v1035_v11, %v2449_v53 }
 0x3f1   : > { %v1059_v8 = vsel %vm747_vm1, %v1058_v36, %v1057_v40 }
 0x3f2   : > { %v1076_v42 = vsel %vm772_vm3, %v1059_v8, %v1075_v30 }
 0x3f6   : > { %v1026_v20 = vpop.permute.xlu1 %1025 }
 0x3f7   : > { %v1044_v19 = vpop.permute.xlu2 %1043  ;;  %v1061_v10 = vperm.slane %v1026_v20, %v2460_v1 }
 0x3f8   : > { %v1070_v49 = vperm.slane %v1044_v19, %v2460_v1 }
 0x3f9   : > { %v1062_v50 = vsel %vm747_vm1, %v1061_v10, %v1060_v32 }
 0x3fa   : > { %v1077_v18 = vsel %vm774_vm4, %v1062_v50, %v1076_v42  ;;  %v1071_v44 = vsel %vm747_vm1, %v1070_v49, %v1069_v24 }
 0x3fe   : > { %v1032_v23 = vpop.permute.xlu1 %1031 }
 0x3ff   : > { %v1064_v39 = vperm.slane %v1032_v23, %v2460_v1  ;;  %v1050_v41 = vpop.permute.xlu2 %1049 }
 0x400   : > { %v1073_v60 = vperm.slane %v1050_v41, %v2460_v1 }
 0x401   : > { %v1065_v33 = vsel %vm747_vm1, %v1064_v39, %v1063_v14 }
 0x402   : > { %v1078_v0 = vsel %vm776_vm5, %v1065_v33, %v1077_v18 }
 0x406   : > { %v1038_v34 = vpop.permute.xlu1 %1037 }
 0x407   : > { %v1067_v17 = vperm.slane %v1038_v34, %v2460_v1 }
 0x409   : > { %v1068_v61 = vsel %vm747_vm1, %v1067_v17, %v1066_v35 }
 0x40a   : > { %v1079_v38 = vsel %vm778_vm6, %v1068_v61, %v1078_v0 }
 0x40b   : > { %v1080_v9 = vsel %vm780_vm7, %v1071_v44, %v1079_v38 }
 0x40e   : > { %v1047_v2 = vpop.permute.xlu1 %1046 }
 0x40f   : > { %v1072_v5 = vperm.slane %v1047_v2, %v2449_v53 }
 0x411   : > { %v1074_v43 = vsel %vm747_vm1, %v1073_v60, %v1072_v5 }
 0x412   : > { %v1081_v59 = vsel %vm782_vm8, %v1074_v43, %v1080_v9 }
 0x413   : > { %1083 = vst.msk [vmem:[%s411_s15] sm:$0xff] %vm785_vm9, %v1081_v59 }
 0x414   : > { %1951 = shalt.err (!%p1948_p4)
}
 0x415   : > { %1621 = dma.vmem_to_hbm [thread:$0]  (%p2133_p3), %s1406_s22, 128, %s1408_s6, %s1379_s28  }
 0x416 PF: > { %s1419_s24 = sand.u32 1, %s1994_s29   ;;  %p2926_p8 = scmp.ge.s32.totalorder %s2006_s10, 2 }
 0x417   : > { %s1420_s16 = scalar_lea.sflag [#allocation5], %s1419_s24 }
 0x418   : > { %p1639_p2 = pnand %p2926_p8, %p2096_p6 }
 0x41a   : > { %p1640_p10 = pneg %p1639_p2 }
 0x41c   : > { %1985 = dma.done.wait (%p1640_p10), %s1420_s16, 128  }
 0x41d   : > { %1987 = vsyncadd (%p1640_p10), %s1420_s16, 4294967168  ;;  %s1430_s17 = scalar_lea.sflag [#allocation13], %s1419_s24 }
 0x41e   : > { %1989 = dma.done.wait (%p1640_p10), %s1430_s17, 128  }
 0x41f   : > { %1991 = vsyncadd (%p1640_p10), %s1430_s17, 4294967168  ;;  %s2927_s10 = sld [smem:[#allocation22_spill]]  ;;  %s2930_s29 = smov %s1998_s30 }
 0x420   : > { %s2928_s25 = sld [smem:[#allocation20_spill]] }
 0x421   : > { %s2929_s9 = sld [smem:[#allocation23_spill]] }
 0x425   : > { %p31_p3 = scmp.ge.s32.totalorder %s2927_s10, 4  }
 0x426   : > { %s2931_s30 = smov %s2928_s25 }
 0x427   :  { %33 = sbr.rel (!%p31_p3) target bundleno = 13 (0xd), region = 131 }
 0x42c   :  { %1436 = vsyncpa [#allocation4], 1 }
 0x42d   :  { %1438 = vsyncpa [#allocation4 + $0x1], 1 }
 0x42e   :  { %1439 = vsyncpa [#allocation7], 1 }
 0x42f   :  { %1441 = vsyncpa [#allocation7 + $0x1], 1 }
 0x430   :  { %1442 = vsyncpa [#allocation10], 1 }
 0x431   :  { %1443 = vsyncpa [#allocation5], 1 }
 0x432   :  { %1445 = vsyncpa [#allocation5 + $0x1], 1 }
 0x433   :  { %1446 = vsyncpa [#allocation13], 1 }
 0x434   :  { %1448 = vsyncpa [#allocation13 + $0x1], 1 }

</bundles_post_ra>
